<compile_context>
chip_gen: v5e
topology: v5e:2x2
jax: 0.10.0
libtpu: 0.0.40
codegen_flags: <defaults>
</compile_context>

<pallas_src>
import jax
import jax.numpy as jnp
from jax import lax
from jax.experimental import pallas as pl
from jax.experimental.pallas import tpu as pltpu

V_THRESHOLD = 1.0
EPS = 1e-5
LANE = 128


def _round_up(x, m):
    return (x + m - 1) // m * m


def basic_block_kernel(xp_ref, w_ref, bias_ref, o_ref):
    # xp_ref:   (1, H+2, W+2, Cin) bf16 halo-padded input image (resident per n)
    # w_ref:    (10, Cin, Cp)      bf16: taps 0..8 = BN-scale-folded conv1 weights,
    #                              tap 9 = identity pad matrix for the shortcut
    # bias_ref: (1, Cp)            f32 folded BN bias with v_threshold subtracted
    # o_ref:    (1, TH, W, Cp)     bf16 output row-tile
    _, TH, W, Cp = o_ref.shape
    _, _, Wp, Cin = xp_ref.shape

    h = pl.program_id(1)
    row0 = pl.multiple_of(h * TH, TH)

    acc = jnp.zeros((TH * W, Cp), jnp.float32)
    short = None
    for kh in range(3):
        # kh shift sits on the 3rd-minor axis -> plain address offset.
        rows = xp_ref[0, pl.ds(row0 + kh, TH), :, :]              # (TH, Wp, Cin)
        for kw in range(3):
            patch = rows[:, kw:kw + W, :].reshape(TH * W, Cin)    # (M, Cin), K = Cin
            acc = acc + jnp.dot(patch, w_ref[kh * 3 + kw],
                                preferred_element_type=jnp.float32)
            if kh == 1 and kw == 1:
                # Identity shortcut: centre tap through the identity "weight",
                # i.e. the MXU emits x lane-padded to Cp (exact bf16 copy).
                short = jnp.dot(patch, w_ref[9],
                                preferred_element_type=jnp.float32)

    # relu(bn1(conv1(x)) - v_threshold) + x   (v_threshold folded into bias)
    out = jnp.maximum(acc + bias_ref[...], 0.0) + short
    o_ref[...] = out.astype(o_ref.dtype).reshape(1, TH, W, Cp)


def _pick_h_tile(H, W):
    # Prefer >= 2 row tiles (so the h axis can shard across v7x's 2 TensorCores)
    # while keeping matmul M = h_tile * W large enough to amortize per-step cost.
    for cand in range(H // 2, 0, -1):
        if H % cand == 0 and cand * W >= 256:
            return cand
    return H


def basic_block_nhwc(x_nhwc, conv1_w, bn_gamma, bn_beta, bn_mean, bn_var,
                     *, h_tile=None):
    """NHWC-native BasicBlock (pruning=True, stride=1, in_planes == planes).

    Returns bf16 NHWC activations so a full network can stay in this layout
    between blocks (no per-block NCHW<->NHWC HBM round trips).
    """
    N, H, W, Cin = x_nhwc.shape
    Cout = conv1_w.shape[0]
    assert Cin == Cout and conv1_w.shape[1:] == (Cin, 3, 3), (
        "kernel implements the stride=1, in_planes == planes identity-shortcut path")
    Cp = _round_up(Cout, LANE)

    if h_tile is None:
        h_tile = _pick_h_tile(H, W)
    assert H % h_tile == 0
    n_h = H // h_tile

    # Folded BN (inference): scale = gamma/sqrt(var+eps), bias = beta - mean*scale.
    inv_std = 1.0 / jnp.sqrt(bn_var.astype(jnp.float32) + EPS)
    scale = bn_gamma.astype(jnp.float32) * inv_std
    bias = bn_beta.astype(jnp.float32) - bn_mean.astype(jnp.float32) * scale

    # Taps 0..8: scale-folded conv weights, tap-major, true K = Cin, only Cout
    # lane-padded. Tap 9: identity pad matrix (shortcut lane-padding on the MXU).
    w = conv1_w.astype(jnp.float32) * scale[:, None, None, None]       # (Cout,Cin,3,3)
    w = jnp.transpose(w, (2, 3, 1, 0)).reshape(9, Cin, Cout)           # (9, Cin, Cout)
    w = jnp.pad(w, ((0, 0), (0, 0), (0, Cp - Cout)))                   # (9, Cin, Cp)
    ident = jnp.pad(jnp.eye(Cin, dtype=jnp.float32), ((0, 0), (0, Cp - Cin)))
    w10 = jnp.concatenate([w, ident[None]], axis=0).astype(jnp.bfloat16)

    # v_threshold folded into the bias; padded lanes get -v_threshold -> relu -> 0.
    bias_p = (jnp.pad(bias, (0, Cp - Cout)) - V_THRESHOLD).reshape(1, Cp)
    bias_p = bias_p.astype(jnp.float32)

    # Spatial halo pad for the 3x3 conv (channels stay at the true Cin).
    xp = jnp.pad(x_nhwc.astype(jnp.bfloat16), ((0, 0), (1, 1), (1, 1), (0, 0)))

    out = pl.pallas_call(
        basic_block_kernel,
        out_shape=jax.ShapeDtypeStruct((N, H, W, Cp), jnp.bfloat16),
        grid_spec=pltpu.PrefetchScalarGridSpec(
            num_scalar_prefetch=0,
            grid=(N, n_h),
            in_specs=[
                # Full padded image, indexed only by n -> stays VMEM-resident
                # across the h steps of one image (single HBM read of x).
                pl.BlockSpec((1, H + 2, W + 2, Cin), lambda n, h: (n, 0, 0, 0)),
                pl.BlockSpec((10, Cin, Cp), lambda n, h: (0, 0, 0)),
                pl.BlockSpec((1, Cp), lambda n, h: (0, 0)),
            ],
            out_specs=pl.BlockSpec((1, h_tile, W, Cp), lambda n, h: (n, h, 0, 0)),
        ),
        compiler_params=pltpu.CompilerParams(
            dimension_semantics=("parallel", "parallel"),
        ),
    )(xp, w10, bias_p)

    return out[..., :Cout]      # strip the Cout lane padding, stay NHWC / bf16


def basic_block_forward(x_nchw, conv1_w, bn_gamma, bn_beta, bn_mean, bn_var,
                        *, h_tile=None):
    # PyTorch-layout adapter (test only). In a full network keep activations
    # NHWC between blocks and call basic_block_nhwc directly.
    x_nhwc = jnp.transpose(x_nchw, (0, 2, 3, 1))
    out = basic_block_nhwc(x_nhwc, conv1_w, bn_gamma, bn_beta, bn_mean, bn_var,
                           h_tile=h_tile)
    return jnp.transpose(out, (0, 3, 1, 2))


def reference_forward(x_nchw, conv1_w, bn_gamma, bn_beta, bn_mean, bn_var):
    # Mirrors the kernel's mixed-precision policy (bf16 activations, BN-scale-
    # folded bf16 weights, f32 accumulation) so the comparison stays tight.
    inv_std = 1.0 / jnp.sqrt(bn_var + EPS)
    scale = bn_gamma * inv_std
    bias = bn_beta - bn_mean * scale
    w = (conv1_w * scale[:, None, None, None]).astype(jnp.bfloat16)
    xb = x_nchw.astype(jnp.bfloat16)
    y = lax.conv_general_dilated(
        xb, w, window_strides=(1, 1), padding=((1, 1), (1, 1)),
        dimension_numbers=("NCHW", "OIHW", "NCHW"),
        preferred_element_type=jnp.float32)
    y = y + bias[None, :, None, None]
    y = jnp.maximum(y - V_THRESHOLD, 0.0)
    return y + xb.astype(jnp.float32)


if __name__ == "__main__":
    # TODO(synk): global spike_list/v_list logging, channel_selection and the
    # stateful LIF neurons (lif1/lif2) are host-side / side-effect bookkeeping
    # with no effect on the returned tensor in the pruning=True path; not implemented.
    key = jax.random.PRNGKey(0)
    k_x, k_w, k_g, k_b, k_m, k_v = jax.random.split(key, 6)

    N, C, H, W = 2, 4, 16, 16            # in_planes == planes == 4, stride == 1
    x = jax.random.normal(k_x, (N, C, H, W), dtype=jnp.float32)
    conv1_w = jax.random.normal(k_w, (C, C, 3, 3), dtype=jnp.float32) * 0.1
    bn_gamma = 1.0 + 0.1 * jax.random.normal(k_g, (C,), dtype=jnp.float32)
    bn_beta = 0.1 * jax.random.normal(k_b, (C,), dtype=jnp.float32)
    bn_mean = 0.1 * jax.random.normal(k_m, (C,), dtype=jnp.float32)
    bn_var = jax.random.uniform(k_v, (C,), minval=0.5, maxval=1.5, dtype=jnp.float32)

    # h_tile=8 exercises the (N, H-tile) grid: 2 row tiles per image.
    out = basic_block_forward(x, conv1_w, bn_gamma, bn_beta, bn_mean, bn_var,
                              h_tile=8)
    out = jax.block_until_ready(out)

    ref = reference_forward(x, conv1_w, bn_gamma, bn_beta, bn_mean, bn_var)
    assert out.shape == (N, C, H, W)
    assert out.dtype == jnp.bfloat16
    max_err = float(jnp.max(jnp.abs(out.astype(jnp.float32) - ref)))
    # bf16 output rounding dominates the error budget.
    assert jnp.allclose(out.astype(jnp.float32), ref, atol=2e-2, rtol=2e-2), max_err

    print("KERNEL_OK")
</pallas_src>

<mosaic_0001>
module attributes {stable_mosaic.version = 11 : i64} {
  func.func @basic_block_kernel(%arg0: i32, %arg1: i32, %arg2: memref<1x18x18x4xbf16, #tpu.memory_space<vmem>>, %arg3: memref<10x4x128xbf16, #tpu.memory_space<vmem>>, %arg4: memref<1x128xf32, #tpu.memory_space<vmem>>, %arg5: memref<1x8x16x128xbf16, #tpu.memory_space<vmem>>) attributes {dimension_semantics = [#tpu.dimension_semantics<parallel>, #tpu.dimension_semantics<parallel>], iteration_bounds = array<i64: 2, 2>, scalar_prefetch = 0 : i64, scratch_operands = 0 : i64, tpu.core_type = #tpu.core_type<tc>, window_params = [{transform_indices = @transform_0, window_bounds = array<i64: 1, 18, 18, 4>}, {pipeline_mode = #tpu.pipeline_mode<synchronous>, transform_indices = @transform_1, window_bounds = array<i64: 10, 4, 128>}, {pipeline_mode = #tpu.pipeline_mode<synchronous>, transform_indices = @transform_2, window_bounds = array<i64: 1, 128>}, {transform_indices = @transform_3, window_bounds = array<i64: 1, 8, 16, 128>}]} {
    %c8_i32 = arith.constant 8 : i32
    %0 = arith.muli %arg1, %c8_i32 : i32
    %1 = tpu.assume_multiple %0, 8 : i32
    %cst = arith.constant 0.000000e+00 : f32
    %2 = vector.broadcast %cst : f32 to vector<128x128xf32>
    %c0_i32 = arith.constant 0 : i32
    %3 = arith.addi %1, %c0_i32 : i32
    %c0 = arith.constant 0 : index
    %4 = arith.index_cast %3 : i32 to index
    %c0_0 = arith.constant 0 : index
    %c0_1 = arith.constant 0 : index
    %5 = vector.load %arg2[%c0, %4, %c0_0, %c0_1] : memref<1x18x18x4xbf16, #tpu.memory_space<vmem>>, vector<1x8x18x4xbf16>
    %6 = vector.shape_cast %5 : vector<1x8x18x4xbf16> to vector<8x18x4xbf16>
    %7 = vector.extract_strided_slice %6 {offsets = [0, 0, 0], sizes = [8, 16, 4], strides = [1, 1, 1]} : vector<8x18x4xbf16> to vector<8x16x4xbf16>
    %8 = vector.shape_cast %7 : vector<8x16x4xbf16> to vector<128x4xbf16>
    %c0_2 = arith.constant 0 : index
    %c0_3 = arith.constant 0 : index
    %c0_4 = arith.constant 0 : index
    %9 = vector.load %arg3[%c0_2, %c0_3, %c0_4] : memref<10x4x128xbf16, #tpu.memory_space<vmem>>, vector<1x4x128xbf16>
    %10 = vector.shape_cast %9 : vector<1x4x128xbf16> to vector<4x128xbf16>
    %cst_5 = arith.constant dense<0.000000e+00> : vector<128x128xf32>
    %11 = tpu.matmul %8, %10, %cst_5 {dimension_numbers = #tpu.dot_dimension_numbers<[1], [0], [0], [1], [0, 0, 1, 1], [], []>} : vector<128x4xbf16>, vector<4x128xbf16>, vector<128x128xf32> -> vector<128x128xf32>
    %12 = arith.addf %2, %11 : vector<128x128xf32>
    %13 = vector.extract_strided_slice %6 {offsets = [0, 1, 0], sizes = [8, 16, 4], strides = [1, 1, 1]} : vector<8x18x4xbf16> to vector<8x16x4xbf16>
    %14 = vector.shape_cast %13 : vector<8x16x4xbf16> to vector<128x4xbf16>
    %c1 = arith.constant 1 : index
    %c0_6 = arith.constant 0 : index
    %c0_7 = arith.constant 0 : index
    %15 = vector.load %arg3[%c1, %c0_6, %c0_7] : memref<10x4x128xbf16, #tpu.memory_space<vmem>>, vector<1x4x128xbf16>
    %16 = vector.shape_cast %15 : vector<1x4x128xbf16> to vector<4x128xbf16>
    %cst_8 = arith.constant dense<0.000000e+00> : vector<128x128xf32>
    %17 = tpu.matmul %14, %16, %cst_8 {dimension_numbers = #tpu.dot_dimension_numbers<[1], [0], [0], [1], [0, 0, 1, 1], [], []>} : vector<128x4xbf16>, vector<4x128xbf16>, vector<128x128xf32> -> vector<128x128xf32>
    %18 = arith.addf %12, %17 : vector<128x128xf32>
    %19 = vector.extract_strided_slice %6 {offsets = [0, 2, 0], sizes = [8, 16, 4], strides = [1, 1, 1]} : vector<8x18x4xbf16> to vector<8x16x4xbf16>
    %20 = vector.shape_cast %19 : vector<8x16x4xbf16> to vector<128x4xbf16>
    %c2 = arith.constant 2 : index
    %c0_9 = arith.constant 0 : index
    %c0_10 = arith.constant 0 : index
    %21 = vector.load %arg3[%c2, %c0_9, %c0_10] : memref<10x4x128xbf16, #tpu.memory_space<vmem>>, vector<1x4x128xbf16>
    %22 = vector.shape_cast %21 : vector<1x4x128xbf16> to vector<4x128xbf16>
    %cst_11 = arith.constant dense<0.000000e+00> : vector<128x128xf32>
    %23 = tpu.matmul %20, %22, %cst_11 {dimension_numbers = #tpu.dot_dimension_numbers<[1], [0], [0], [1], [0, 0, 1, 1], [], []>} : vector<128x4xbf16>, vector<4x128xbf16>, vector<128x128xf32> -> vector<128x128xf32>
    %24 = arith.addf %18, %23 : vector<128x128xf32>
    %c1_i32 = arith.constant 1 : i32
    %25 = arith.addi %1, %c1_i32 : i32
    %c0_12 = arith.constant 0 : index
    %26 = arith.index_cast %25 : i32 to index
    %c0_13 = arith.constant 0 : index
    %c0_14 = arith.constant 0 : index
    %27 = vector.load %arg2[%c0_12, %26, %c0_13, %c0_14] : memref<1x18x18x4xbf16, #tpu.memory_space<vmem>>, vector<1x8x18x4xbf16>
    %28 = vector.shape_cast %27 : vector<1x8x18x4xbf16> to vector<8x18x4xbf16>
    %29 = vector.extract_strided_slice %28 {offsets = [0, 0, 0], sizes = [8, 16, 4], strides = [1, 1, 1]} : vector<8x18x4xbf16> to vector<8x16x4xbf16>
    %30 = vector.shape_cast %29 : vector<8x16x4xbf16> to vector<128x4xbf16>
    %c3 = arith.constant 3 : index
    %c0_15 = arith.constant 0 : index
    %c0_16 = arith.constant 0 : index
    %31 = vector.load %arg3[%c3, %c0_15, %c0_16] : memref<10x4x128xbf16, #tpu.memory_space<vmem>>, vector<1x4x128xbf16>
    %32 = vector.shape_cast %31 : vector<1x4x128xbf16> to vector<4x128xbf16>
    %cst_17 = arith.constant dense<0.000000e+00> : vector<128x128xf32>
    %33 = tpu.matmul %30, %32, %cst_17 {dimension_numbers = #tpu.dot_dimension_numbers<[1], [0], [0], [1], [0, 0, 1, 1], [], []>} : vector<128x4xbf16>, vector<4x128xbf16>, vector<128x128xf32> -> vector<128x128xf32>
    %34 = arith.addf %24, %33 : vector<128x128xf32>
    %35 = vector.extract_strided_slice %28 {offsets = [0, 1, 0], sizes = [8, 16, 4], strides = [1, 1, 1]} : vector<8x18x4xbf16> to vector<8x16x4xbf16>
    %36 = vector.shape_cast %35 : vector<8x16x4xbf16> to vector<128x4xbf16>
    %c4 = arith.constant 4 : index
    %c0_18 = arith.constant 0 : index
    %c0_19 = arith.constant 0 : index
    %37 = vector.load %arg3[%c4, %c0_18, %c0_19] : memref<10x4x128xbf16, #tpu.memory_space<vmem>>, vector<1x4x128xbf16>
    %38 = vector.shape_cast %37 : vector<1x4x128xbf16> to vector<4x128xbf16>
    %cst_20 = arith.constant dense<0.000000e+00> : vector<128x128xf32>
    %39 = tpu.matmul %36, %38, %cst_20 {dimension_numbers = #tpu.dot_dimension_numbers<[1], [0], [0], [1], [0, 0, 1, 1], [], []>} : vector<128x4xbf16>, vector<4x128xbf16>, vector<128x128xf32> -> vector<128x128xf32>
    %40 = arith.addf %34, %39 : vector<128x128xf32>
    %c9 = arith.constant 9 : index
    %c0_21 = arith.constant 0 : index
    %c0_22 = arith.constant 0 : index
    %41 = vector.load %arg3[%c9, %c0_21, %c0_22] : memref<10x4x128xbf16, #tpu.memory_space<vmem>>, vector<1x4x128xbf16>
    %42 = vector.shape_cast %41 : vector<1x4x128xbf16> to vector<4x128xbf16>
    %cst_23 = arith.constant dense<0.000000e+00> : vector<128x128xf32>
    %43 = tpu.matmul %36, %42, %cst_23 {dimension_numbers = #tpu.dot_dimension_numbers<[1], [0], [0], [1], [0, 0, 1, 1], [], []>} : vector<128x4xbf16>, vector<4x128xbf16>, vector<128x128xf32> -> vector<128x128xf32>
    %44 = vector.extract_strided_slice %28 {offsets = [0, 2, 0], sizes = [8, 16, 4], strides = [1, 1, 1]} : vector<8x18x4xbf16> to vector<8x16x4xbf16>
    %45 = vector.shape_cast %44 : vector<8x16x4xbf16> to vector<128x4xbf16>
    %c5 = arith.constant 5 : index
    %c0_24 = arith.constant 0 : index
    %c0_25 = arith.constant 0 : index
    %46 = vector.load %arg3[%c5, %c0_24, %c0_25] : memref<10x4x128xbf16, #tpu.memory_space<vmem>>, vector<1x4x128xbf16>
    %47 = vector.shape_cast %46 : vector<1x4x128xbf16> to vector<4x128xbf16>
    %cst_26 = arith.constant dense<0.000000e+00> : vector<128x128xf32>
    %48 = tpu.matmul %45, %47, %cst_26 {dimension_numbers = #tpu.dot_dimension_numbers<[1], [0], [0], [1], [0, 0, 1, 1], [], []>} : vector<128x4xbf16>, vector<4x128xbf16>, vector<128x128xf32> -> vector<128x128xf32>
    %49 = arith.addf %40, %48 : vector<128x128xf32>
    %c2_i32 = arith.constant 2 : i32
    %50 = arith.addi %1, %c2_i32 : i32
    %c0_27 = arith.constant 0 : index
    %51 = arith.index_cast %50 : i32 to index
    %c0_28 = arith.constant 0 : index
    %c0_29 = arith.constant 0 : index
    %52 = vector.load %arg2[%c0_27, %51, %c0_28, %c0_29] : memref<1x18x18x4xbf16, #tpu.memory_space<vmem>>, vector<1x8x18x4xbf16>
    %53 = vector.shape_cast %52 : vector<1x8x18x4xbf16> to vector<8x18x4xbf16>
    %54 = vector.extract_strided_slice %53 {offsets = [0, 0, 0], sizes = [8, 16, 4], strides = [1, 1, 1]} : vector<8x18x4xbf16> to vector<8x16x4xbf16>
    %55 = vector.shape_cast %54 : vector<8x16x4xbf16> to vector<128x4xbf16>
    %c6 = arith.constant 6 : index
    %c0_30 = arith.constant 0 : index
    %c0_31 = arith.constant 0 : index
    %56 = vector.load %arg3[%c6, %c0_30, %c0_31] : memref<10x4x128xbf16, #tpu.memory_space<vmem>>, vector<1x4x128xbf16>
    %57 = vector.shape_cast %56 : vector<1x4x128xbf16> to vector<4x128xbf16>
    %cst_32 = arith.constant dense<0.000000e+00> : vector<128x128xf32>
    %58 = tpu.matmul %55, %57, %cst_32 {dimension_numbers = #tpu.dot_dimension_numbers<[1], [0], [0], [1], [0, 0, 1, 1], [], []>} : vector<128x4xbf16>, vector<4x128xbf16>, vector<128x128xf32> -> vector<128x128xf32>
    %59 = arith.addf %49, %58 : vector<128x128xf32>
    %60 = vector.extract_strided_slice %53 {offsets = [0, 1, 0], sizes = [8, 16, 4], strides = [1, 1, 1]} : vector<8x18x4xbf16> to vector<8x16x4xbf16>
    %61 = vector.shape_cast %60 : vector<8x16x4xbf16> to vector<128x4xbf16>
    %c7 = arith.constant 7 : index
    %c0_33 = arith.constant 0 : index
    %c0_34 = arith.constant 0 : index
    %62 = vector.load %arg3[%c7, %c0_33, %c0_34] : memref<10x4x128xbf16, #tpu.memory_space<vmem>>, vector<1x4x128xbf16>
    %63 = vector.shape_cast %62 : vector<1x4x128xbf16> to vector<4x128xbf16>
    %cst_35 = arith.constant dense<0.000000e+00> : vector<128x128xf32>
    %64 = tpu.matmul %61, %63, %cst_35 {dimension_numbers = #tpu.dot_dimension_numbers<[1], [0], [0], [1], [0, 0, 1, 1], [], []>} : vector<128x4xbf16>, vector<4x128xbf16>, vector<128x128xf32> -> vector<128x128xf32>
    %65 = arith.addf %59, %64 : vector<128x128xf32>
    %66 = vector.extract_strided_slice %53 {offsets = [0, 2, 0], sizes = [8, 16, 4], strides = [1, 1, 1]} : vector<8x18x4xbf16> to vector<8x16x4xbf16>
    %67 = vector.shape_cast %66 : vector<8x16x4xbf16> to vector<128x4xbf16>
    %c8 = arith.constant 8 : index
    %c0_36 = arith.constant 0 : index
    %c0_37 = arith.constant 0 : index
    %68 = vector.load %arg3[%c8, %c0_36, %c0_37] : memref<10x4x128xbf16, #tpu.memory_space<vmem>>, vector<1x4x128xbf16>
    %69 = vector.shape_cast %68 : vector<1x4x128xbf16> to vector<4x128xbf16>
    %cst_38 = arith.constant dense<0.000000e+00> : vector<128x128xf32>
    %70 = tpu.matmul %67, %69, %cst_38 {dimension_numbers = #tpu.dot_dimension_numbers<[1], [0], [0], [1], [0, 0, 1, 1], [], []>} : vector<128x4xbf16>, vector<4x128xbf16>, vector<128x128xf32> -> vector<128x128xf32>
    %71 = arith.addf %65, %70 : vector<128x128xf32>
    %c0_39 = arith.constant 0 : index
    %c0_40 = arith.constant 0 : index
    %72 = vector.load %arg4[%c0_39, %c0_40] : memref<1x128xf32, #tpu.memory_space<vmem>>, vector<1x128xf32>
    %73 = vector.broadcast %72 : vector<1x128xf32> to vector<128x128xf32>
    %74 = arith.addf %71, %73 : vector<128x128xf32>
    %cst_41 = arith.constant 0.000000e+00 : f32
    %75 = vector.broadcast %cst_41 : f32 to vector<128x128xf32>
    %76 = arith.maximumf %74, %75 : vector<128x128xf32>
    %77 = arith.addf %76, %43 : vector<128x128xf32>
    %78 = arith.truncf %77 : vector<128x128xf32> to vector<128x128xbf16>
    %79 = vector.shape_cast %78 : vector<128x128xbf16> to vector<1x8x16x128xbf16>
    %c0_42 = arith.constant 0 : index
    %c0_43 = arith.constant 0 : index
    %c0_44 = arith.constant 0 : index
    %c0_45 = arith.constant 0 : index
    %80 = vector.load %arg5[%c0_42, %c0_43, %c0_44, %c0_45] : memref<1x8x16x128xbf16, #tpu.memory_space<vmem>>, vector<1x8x16x128xbf16>
    tpu.vector_store %arg5[%c0_42, %c0_43, %c0_44, %c0_45], %79 {strides = array<i32>} : memref<1x8x16x128xbf16, #tpu.memory_space<vmem>>, vector<1x8x16x128xbf16>,
    return
  }
  func.func @transform_0(%arg0: i32, %arg1: i32) -> (i32, i32, i32, i32) {
    %c0_i32 = arith.constant 0 : i32
    %c0_i32_0 = arith.constant 0 : i32
    %c0_i32_1 = arith.constant 0 : i32
    %c0_i32_2 = arith.constant 0 : i32
    return %arg0, %c0_i32, %c0_i32_0, %c0_i32_1 : i32, i32, i32, i32
  }
  func.func @transform_1(%arg0: i32, %arg1: i32) -> (i32, i32, i32) {
    %c0_i32 = arith.constant 0 : i32
    %c0_i32_0 = arith.constant 0 : i32
    %c0_i32_1 = arith.constant 0 : i32
    %c0_i32_2 = arith.constant 0 : i32
    return %c0_i32, %c0_i32_0, %c0_i32_1 : i32, i32, i32
  }
  func.func @transform_2(%arg0: i32, %arg1: i32) -> (i32, i32) {
    %c0_i32 = arith.constant 0 : i32
    %c0_i32_0 = arith.constant 0 : i32
    %c0_i32_1 = arith.constant 0 : i32
    return %c0_i32, %c0_i32_0 : i32, i32
  }
  func.func @transform_3(%arg0: i32, %arg1: i32) -> (i32, i32, i32, i32) {
    %c0_i32 = arith.constant 0 : i32
    %c0_i32_0 = arith.constant 0 : i32
    %c0_i32_1 = arith.constant 0 : i32
    return %arg0, %arg1, %c0_i32, %c0_i32_0 : i32, i32, i32, i32
  }
}

</mosaic_0001>

<bundles_post_ra>
// kernel: tpu_custom_call.1
= control target key start
LH: loop header
LB: loop body
LE: loop exit
PB: predicated region body
PF: predicated region fallthrough
CT: control target
= control target key end

     0   :  { %8 = vsyncpa [#allocation3], 0  ;;  %s3876_s0 = inlined_call_operand.vmem [shape: bf16[2,18,18,4], index: 0, kind: input, shape index: {}]   ;;  %s3877_s1 = inlined_call_operand.vmem [shape: bf16[10,4,128], index: 1, kind: input, shape index: {}]   ;;  %s3878_s2 = inlined_call_operand.vmem [shape: f32[1,128], index: 2, kind: input, shape index: {}]   ;;  %s3879_s3 = inlined_call_operand.hbm [shape: bf16[2,16,16,128], index: 3, kind: output, shape index: {}]  }
   0x1   :  { %10 = vsyncpa [#allocation3 + $0x1], 0  ;;  %s2912_s12 = smov 0   ;;  %s2914_s13 = smov 0  }
   0x2   :  { %s2916_s14 = smov 0   ;;  %s2918_s15 = smov 0  }
   0x3   :  { %s2920_s16 = smov 0   ;;  %s2922_s17 = smov 0  }
   0x4   :  { %s2924_s18 = smov 0   ;;  %s2926_s19 = smov 0  }
   0x5 LB: > { %s2365_s20 = sadd.s32 4294967295, %s2888_s19   ;;  %s2366_s21 = sadd.s32 4294967294, %s2888_s19   ;;  %s2888_s19 = sphi %s2926_s19, %s16_s19   ;;  %s2884_s18 = sphi %s2924_s18, %s3902_s18   ;;  %s2880_s17 = sphi %s2922_s17, %s3901_s17   ;;  %s2876_s16 = sphi %s2920_s16, %s3900_s16   ;;  %s2872_s15 = sphi %s2918_s15, %s3899_s15   ;;  %s2868_s14 = sphi %s2916_s14, %s3898_s14   ;;  %s2864_s13 = sphi %s2914_s13, %s3897_s13   ;;  %s2860_s12 = sphi %s2912_s12, %s3896_s12  }
   0x6   : > { %s25_s22 = sadd.s32 1, %s2880_s17  ;;  %s28_s23 = sadd.s32 1, %s2884_s18 }
   0x7   : > { %p26_p0 = scmp.ge.s32.totalorder %s25_s22, 2  ;;  %p115_p1 = scmp.ne.s32.totalorder %s2868_s14, %s2864_s13 }
   0x8   : > { %p116_p2 = scmp.eq.s32.totalorder %s2365_s20, 3  ;;  %p121_p5 = scmp.ne.s32.totalorder %s2864_s13, %s2860_s12 }
   0x9   : > { %s3904_s22 = smov (%p26_p0, %s25_s22), 0  ;;  %s3906_s23 = smov (!%p26_p0, %s28_s23), %s2884_s18 }
   0xa   : > { %s101_s24 = ssub.s32 %s2880_s17, %s3904_s22  ;;  %p2963_p3 = por %p116_p2, %p115_p1 }
   0xb   : > { %p30_p4 = scmp.ge.s32.totalorder %s3906_s23, 2  ;;  %p122_p6 = scmp.eq.s32.totalorder %s2366_s21, 3 }
   0xc   : > { %p2369_p7 = scmp.ge.s32.totalorder %s2888_s19, 1  ;;  %p154_p9 = scmp.lt.s32.totalorder %s2888_s19, 5 }
   0xd   : > { %s3908_s23 = smov (%p30_p4, %s3906_s23), 0  ;;  %p2972_p8 = por %p122_p6, %p121_p5 }
   0xe   : > { %s100_s27 = ssub.s32 %s2884_s18, %s3908_s23  ;;  %s105_s28 = sadd.s32 1, %s2868_s14 }
   0xf   : > { %s102_s29 = sor.u32 %s101_s24, %s100_s27  ;;  %p155_p10 = pnand %p2369_p7, %p154_p9 }
  0x10   : > { %p103_p11 = scmp.eq.s32.totalorder %s102_s29, 0 }
  0x11   : > { %158 = sbr.rel (%p155_p10) target bundleno = 509 (0x1fd), region = 32 }
  0x12   : > { %s2981_s30 = scalar_select %p103_p11, %s2868_s14, %s105_s28  }
  0x16   : > { %v213_v0 = vld [vmem:[%s3877_s1] sm:$0x3]  ;;  %vm460_vm0 = vcmask 1041408   ;;  %p178_p12 = scmp.lt.s32.totalorder %s2876_s16, 1  ;;  %v2375_v2 = vld [vmem:[%s3877_s1 + $0x2] sm:$0x3] }
  0x17   : > { %v578_v1 = vsel %vm460_vm0, %v213_v0, 0  ;;  %v462_v3 = vsel %vm460_vm0, %v2375_v2, 0  ;;  %v2432_v4 = vld [vmem:[%s3877_s1 + $0x4] sm:$0x3]  ;;  %s2643_s11 = smul.u32 96, %s2872_s15  ;;  %vm435_vm1 = vcmask 31744  }
  0x18   : > { %2717 = vmatpush.bf16.msra.mxu3 %v578_v1  ;;  %s179_s8 = scalar_select %p178_p12, %s2876_s16, 1  ;;  %587 = vmatpush.bf16.msra.mxu1 %v578_v1  ;;  %v747_v5 = vsel %vm460_vm0, %v2432_v4, 0  ;;  %v2467_v6 = vld [vmem:[%s3877_s1 + $0x6] sm:$0x3]  ;;  %v2508_v7 = vld [vmem:[%s3877_s1 + $0x8] sm:$0x3] }
  0x19   : > { %2716 = vmatpush.bf16.msra.mxu2 %v462_v3  ;;  %471 = vmatpush.bf16.msra.mxu0 %v462_v3  ;;  %v909_v8 = vsel %vm460_vm0, %v2467_v6, 0  ;;  %v1219_v9 = vsel %vm460_vm0, %v2508_v7, 0  ;;  %v2517_v10 = vld [vmem:[%s3877_s1 + $0x12] sm:$0x3]  ;;  %vm214_vm2 = vsmask.f32 3328 }
  0x1a   : > { %s2718_s28 = smul.u32 216, %s179_s8  ;;  %v1289_v11 = vsel %vm460_vm0, %v2517_v10, 0  ;;  %vm215_vm3 = vsmask.f32 7440  ;;  %vm637_vm5 = vcmask 1042432   ;;  %vm638_vm6 = vcmask 1046532  }
  0x1b   : > { %vm3055_vm4 = vmor %vm214_vm2, %vm215_vm3  ;;  %s175_s5 = sand.u32 1, %s2864_s13   ;;  %s2639_s8 = sshll.u32 %s2876_s16, 5 }
  0x1c   : > { %918 = vmatpush.bf16.msrb.mxu3 %v909_v8  ;;  %s182_s7 = scalar_lea.vmem %s3876_s0, %s2718_s28  ;;  %1298 = vmatpush.bf16.msrb.mxu1 %v1289_v11  ;;  %vm3172_vm7 = vmor %vm637_vm5, %vm638_vm6  ;;  %s2370_s6 = sshll.u32 %s175_s5, 6 }
  0x1d   : > { %756 = vmatpush.bf16.msrb.mxu2 %v747_v5  ;;  %1228 = vmatpush.bf16.msrb.mxu0 %v1219_v9  ;;  %s3013_s9 = scalar_lea.vmem %s182_s7, %s2643_s11  ;;  %s3779_s7 = scalar_lea.vmem [#allocation2], %s2370_s6 }
  0x1e   : > { %v2648_v12 = vld [vmem:[%s3013_s9 + $0x30] sm:$0xff]  ;;  %v3023_v15 = vld [vmem:[%s3013_s9 + $0x38] sm:$0x1]  ;;  %v3032_v21 = vld [vmem:[%s3013_s9] sm:$0xf]  ;;  %s2276_s21 = sshll.u32 %s3779_s7, 4  ;;  %s2277_s21 = int_to_ptr.vmem [resolvable:$true] %s2276_s21 }
  0x1f   : > { %v3017_v13 = vld [vmem:[%s3013_s9 + $0x30] sm:$0xf]  ;;  %v3020_v14 = vld [vmem:[%s3013_s9 + $0x34] sm:$0xf]  ;;  %2420 = vmatmul.msk.bf16.vlgmr.msra.gmra.mxu3 %vm435_vm1, %v2648_v12  ;;  %v333_v20 = vshll.u32 %v3023_v15, 16  ;;  %v2644_v23 = vld [vmem:[%s3013_s9] sm:$0xff] }
  0x20   : > { %v314_v16 = vshrl.u32 %v3017_v13, 16  ;;  %v317_v17 = vshll.u32 %v3017_v13, 16  ;;  %v323_v18 = vshll.u32 %v3020_v14, 16  ;;  %v327_v19 = vshrl.u32 %v3020_v14, 16  ;;  %v3035_v22 = vld [vmem:[%s3013_s9 + $0x4] sm:$0xf]  ;;  %2416 = vmatmul.msk.bf16.vlgmr.msra.gmra.mxu1 %vm435_vm1, %v2644_v23 }
  0x21   : > { %v3039_v28 = vld [vmem:[%s3013_s9 + $0x8] sm:$0x1]  ;;  %v335_v29 = vrot.slane %v333_v20, 5  ;;  %v218_v30 = vshrl.u32 %v3032_v21, 16  ;;  %v221_v31 = vshll.u32 %v3032_v21, 16  ;;  %v227_v32 = vshll.u32 %v3035_v22, 16 }
  0x22   : > { %v316_v24 = vrot.slane %v314_v16, 4  ;;  %v319_v25 = vrot.slane %v317_v17, 5  ;;  %v325_v26 = vrot.slane %v323_v18, 5  ;;  %v329_v27 = vrot.slane %v327_v19, 4  ;;  %v3048_v37 = vld [vmem:[%s3013_s9 + $0x3c] sm:$0xf] }
  0x23   : > { %v231_v35 = vshrl.u32 %v3035_v22, 16  ;;  %v237_v36 = vshll.u32 %v3039_v28, 16  ;;  %v3051_v38 = vld [vmem:[%s3013_s9 + $0x40] sm:$0xf]  ;;  %v220_v40 = vrot.slane %v218_v30, 4  ;;  %v223_v41 = vrot.slane %v221_v31, 5 }
  0x24   : > { %v320_v33 = vor.u32 %v319_v25, %v316_v24  ;;  %v330_v34 = vor.u32 %v329_v27, %v325_v26  ;;  %v229_v42 = vrot.slane %v227_v32, 5  ;;  %v338_v48 = vshrl.u32 %v3048_v37, 16  ;;  %v3067_v54 = vld [vmem:[%s3013_s9 + $0x44] sm:$0x1]  ;;  %v3071_v56 = vld [vmem:[%s3013_s9 + $0xc] sm:$0xf] }
  0x25   : > { %v233_v45 = vrot.slane %v231_v35, 4  ;;  %v239_v46 = vrot.slane %v237_v36, 5  ;;  %v224_v47 = vor.u32 %v223_v41, %v220_v40  ;;  %v341_v49 = vshll.u32 %v3048_v37, 16  ;;  %v3077_v4 = vld [vmem:[%s3013_s9 + $0x10] sm:$0xf]  ;;  %v2649_v16 = vld [vmem:[%s3013_s9 + $0x3c] sm:$0xff] }
  0x26   : > { %v321_v43 = vrot.slane %v320_v33, 4  ;;  %v331_v44 = vrot.slane %v330_v34, 4  ;;  %v347_v50 = vshll.u32 %v3051_v38, 16  ;;  %v351_v55 = vshrl.u32 %v3051_v38, 16  ;;  %v3083_v10 = vld [vmem:[%s3013_s9 + $0x14] sm:$0x1] }
  0x27   : > { %v234_v53 = vor.u32 %v233_v45, %v229_v42  ;;  %v225_v59 = vrot.slane %v224_v47, 4  ;;  %v340_v60 = vrot.slane %v338_v48, 4  ;;  %v343_v62 = vrot.slane %v341_v49, 5  ;;  %v3086_v11 = vld [vmem:[%s3013_s9 + $0x48] sm:$0xf]  ;;  %v2645_v30 = vld [vmem:[%s3013_s9 + $0xc] sm:$0xff] }
  0x28   : > { %v326_v51 = vsel %vm3055_vm4, %v321_v43, %v325_v26  ;;  %v336_v52 = vsel %vm3055_vm4, %v331_v44, %v335_v29  ;;  %v349_v63 = vrot.slane %v347_v50, 5  ;;  %v353_v0 = vrot.slane %v351_v55, 4  ;;  %v3096_v31 = vld [vmem:[%s3013_s9 + $0x4c] sm:$0xf]  ;;  %v3109_v44 = vld [vmem:[%s3013_s9 + $0x50] sm:$0x1] }
  0x29   : > { %v419_v57 = vunpack.c.l.b16 %v326_v51  ;;  %v420_v58 = vunpack.c.l.b16 %v336_v52  ;;  %v235_v61 = vrot.slane %v234_v53, 4  ;;  %v230_v2 = vsel %vm3055_vm4, %v225_v59, %v229_v42  ;;  %v3106_v42 = vld [vmem:[%s3013_s9 + $0x18] sm:$0xf]  ;;  %s2261_s27 = scalar_lea.sflag [#allocation3], %s175_s5 }
  0x2a   : > { %v357_v3 = vshll.u32 %v3067_v54, 16  ;;  %v242_v5 = vshrl.u32 %v3071_v56, 16  ;;  %v411_v7 = vunpack.c.l.b16 %v230_v2  ;;  %v344_v8 = vor.u32 %v343_v62, %v340_v60  ;;  %v3126_v2 = vld [vmem:[%s3013_s9 + $0x20] sm:$0x1] }
  0x2b   : > { %v431_v1 = vpack.c.b16 %v420_v58, %v419_v57  ;;  %v240_v6 = vsel %vm3055_vm4, %v235_v61, %v239_v46  ;;  %v354_v9 = vor.u32 %v353_v0, %v349_v63  ;;  %v245_v19 = vshll.u32 %v3071_v56, 16  ;;  %v3116_v57 = vld [vmem:[%s3013_s9 + $0x1c] sm:$0xf] }
  0x2c   : > { %v412_v12 = vunpack.c.l.b16 %v240_v6  ;;  %v359_v17 = vrot.slane %v357_v3, 5  ;;  %v244_v18 = vrot.slane %v242_v5, 4  ;;  %v345_v20 = vrot.slane %v344_v8, 4 }
  0x2d   : > { %2380 = vmatmul.msk.bf16.vlgmr.msra.gmra.mxu2 %vm435_vm1, %v431_v1  ;;  %v355_v23 = vrot.slane %v354_v9, 4  ;;  %v251_v24 = vshll.u32 %v3077_v4, 16  ;;  %v255_v25 = vshrl.u32 %v3077_v4, 16  ;;  %v247_v27 = vrot.slane %v245_v19, 5 }
  0x2e   : > { %v427_v26 = vpack.c.b16 %v412_v12, %v411_v7  ;;  %v261_v29 = vshll.u32 %v3083_v10, 16  ;;  %v362_v32 = vshrl.u32 %v3086_v11, 16  ;;  %v350_v33 = vsel %vm3055_vm4, %v345_v20, %v349_v63 }
  0x2f   : > { %v360_v34 = vsel %vm3055_vm4, %v355_v23, %v359_v17  ;;  %v253_v35 = vrot.slane %v251_v24, 5  ;;  %v257_v36 = vrot.slane %v255_v25, 4  ;;  %2421 = vmatmul.msk.bf16.gmra.mxu3 %vm435_vm1, %v2649_v16  ;;  %v248_v40 = vor.u32 %v247_v27, %v244_v18  ;;  %v3132_v24 = vld [vmem:[%s3013_s9 + $0x54] sm:$0xf]  ;;  %v3135_v27 = vld [vmem:[%s3013_s9 + $0x58] sm:$0xf] }
  0x30   : > { %2376 = vmatmul.msk.bf16.vlgmr.msra.gmra.mxu0 %vm435_vm1, %v427_v26  ;;  %v263_v41 = vrot.slane %v261_v29, 5  ;;  %v364_v45 = vrot.slane %v362_v32, 4  ;;  %v365_v46 = vshll.u32 %v3086_v11, 16  ;;  %v371_v47 = vshll.u32 %v3096_v31, 16  ;;  %2417 = vmatmul.msk.bf16.gmra.mxu1 %vm435_vm1, %v2645_v30  ;;  %v2650_v30 = vld [vmem:[%s3013_s9 + $0x48] sm:$0xff] }
  0x31   : > { %v258_v43 = vor.u32 %v257_v36, %v253_v35  ;;  %v421_v48 = vunpack.c.l.b16 %v350_v33  ;;  %v422_v49 = vunpack.c.l.b16 %v360_v34  ;;  %v249_v50 = vrot.slane %v248_v40, 4  ;;  %v2646_v36 = vld [vmem:[%s3013_s9 + $0x18] sm:$0xff] }
  0x32   : > { %v375_v51 = vshrl.u32 %v3096_v31, 16  ;;  %v367_v53 = vrot.slane %v365_v46, 5  ;;  %v373_v55 = vrot.slane %v371_v47, 5  ;;  %v266_v58 = vshrl.u32 %v3106_v42, 16  ;;  %v3149_v47 = vld [vmem:[%s3013_s9 + $0x24] sm:$0xf] }
  0x33   : > { %v259_v52 = vrot.slane %v258_v43, 4  ;;  %v381_v60 = vshll.u32 %v3109_v44, 16  ;;  %v269_v61 = vshll.u32 %v3106_v42, 16  ;;  %v254_v62 = vsel %vm3055_vm4, %v249_v50, %v253_v35  ;;  %v3154_v50 = vld [vmem:[%s3013_s9 + $0x28] sm:$0xf] }
  0x34   : > { %v377_v59 = vrot.slane %v375_v51, 4  ;;  %v368_v0 = vor.u32 %v367_v53, %v364_v45  ;;  %v268_v3 = vrot.slane %v266_v58, 4  ;;  %v275_v6 = vshll.u32 %v3116_v57, 16 }
  0x35   : > { %v264_v63 = vsel %vm3055_vm4, %v259_v52, %v263_v41  ;;  %v271_v5 = vrot.slane %v269_v61, 5  ;;  %v432_v7 = vpack.c.b16 %v422_v49, %v421_v48  ;;  %v279_v8 = vshrl.u32 %v3116_v57, 16  ;;  %v3157_v52 = vld [vmem:[%s3013_s9 + $0x5c] sm:$0x1] }
  0x36   : > { %v378_v1 = vor.u32 %v377_v59, %v373_v55  ;;  %v413_v9 = vunpack.c.l.b16 %v254_v62  ;;  %v414_v12 = vunpack.c.l.b16 %v264_v63  ;;  %v383_v16 = vrot.slane %v381_v60, 5 }
  0x37   : > { %v277_v17 = vrot.slane %v275_v6, 5  ;;  %v369_v18 = vrot.slane %v368_v0, 4  ;;  %v281_v20 = vrot.slane %v279_v8, 4  ;;  %v285_v23 = vshll.u32 %v3126_v2, 16 }
  0x38   : > { %v379_v19 = vrot.slane %v378_v1, 4  ;;  %v272_v25 = vor.u32 %v271_v5, %v268_v3  ;;  %v428_v29 = vpack.c.b16 %v414_v12, %v413_v9  ;;  %v386_v32 = vshrl.u32 %v3132_v24, 16 }
  0x39   : > { %v282_v26 = vor.u32 %v281_v20, %v277_v17  ;;  %v374_v33 = vsel %vm3055_vm4, %v369_v18, %v373_v55  ;;  %v287_v35 = vrot.slane %v285_v23, 5  ;;  %v389_v40 = vshll.u32 %v3132_v24, 16  ;;  %v3182_v18 = vld [vmem:[%s3013_s9 + $0x10] sm:$0xf] }
  0x3a   : > { %v384_v34 = vsel %vm3055_vm4, %v379_v19, %v383_v16  ;;  %v273_v41 = vrot.slane %v272_v25, 4  ;;  %v395_v45 = vshll.u32 %v3135_v27, 16  ;;  %v399_v46 = vshrl.u32 %v3135_v27, 16  ;;  %v3188_v25 = vld [vmem:[%s3013_s9 + $0x2c] sm:$0x1] }
  0x3b   : > { %v283_v43 = vrot.slane %v282_v26, 4  ;;  %v423_v48 = vunpack.c.l.b16 %v374_v33  ;;  %v388_v49 = vrot.slane %v386_v32, 4  ;;  %v424_v51 = vunpack.c.l.b16 %v384_v34 }
  0x3c   : > { %v391_v53 = vrot.slane %v389_v40, 5  ;;  %v290_v55 = vshrl.u32 %v3149_v47, 16  ;;  %v278_v58 = vsel %vm3055_vm4, %v273_v41, %v277_v17  ;;  %v3165_v60 = vrot.slane %v395_v45, 5  ;;  %v3179_v17 = vld [vmem:[%s3013_s9 + $0xc] sm:$0xf] }
  0x3d   : > { %2381 = vmatmul.msk.bf16.gmra.mxu2 %vm435_vm1, %v432_v7  ;;  %v288_v59 = vsel %vm3055_vm4, %v283_v43, %v287_v35  ;;  %v401_v61 = vrot.slane %v399_v46, 4  ;;  %v293_v62 = vshll.u32 %v3149_v47, 16  ;;  %v299_v63 = vshll.u32 %v3154_v50, 16  ;;  %v2651_v46 = vld [vmem:[%s3013_s9 + $0x54] sm:$0xff] }
  0x3e   : > { %v303_v0 = vshrl.u32 %v3154_v50, 16  ;;  %v645_v1 = vrot.slane %v3039_v28, 5  ;;  %v405_v3 = vshll.u32 %v3157_v52, 16  ;;  %v2424_v6 = vrot.slane %v3032_v21, 9 }
  0x3f   : > { %2422 = vmatmul.msk.bf16.gmra.mxu3 %vm435_vm1, %v2650_v30  ;;  %v642_v7 = vrot.slane %v3035_v22, 5  ;;  %v433_v8 = vpack.c.b16 %v424_v51, %v423_v48  ;;  %v415_v9 = vunpack.c.l.b16 %v278_v58  ;;  %v392_v12 = vor.u32 %v391_v53, %v388_v49 }
  0x40   : > { %2377 = vmatmul.msk.bf16.gmra.mxu0 %vm435_vm1, %v428_v29  ;;  %2418 = vmatmul.msk.bf16.gmra.mxu1 %vm435_vm1, %v2646_v36  ;;  %v292_v16 = vrot.slane %v290_v55, 4  ;;  %v416_v19 = vunpack.c.l.b16 %v288_v59  ;;  %v402_v28 = vor.u32 %v401_v61, %v3165_v60  ;;  %v295_v21 = vrot.slane %v293_v62, 5  ;;  %v2534_v55 = vld [vmem:[%s3877_s1 + $0xa] sm:$0x3] }
  0x41   : > { %v643_v20 = vsel %vm3172_vm7, %v2424_v6, %v642_v7  ;;  %v644_v23 = vrot.slane %v642_v7, 4  ;;  %v3190_v22 = vrot.slane %v299_v63, 5  ;;  %v305_v26 = vrot.slane %v303_v0, 4  ;;  %v3209_v0 = vld [vmem:[%s3013_s9 + $0x14] sm:$0x1] }
  0x42   : > { %v698_v29 = vunpack.c.l.b16 %v643_v20  ;;  %v977_v32 = vshrl.u32 %v3179_v17, 16  ;;  %v980_v33 = vshll.u32 %v3179_v17, 16  ;;  %v986_v34 = vshll.u32 %v3182_v18, 16  ;;  %v2610_v20 = vld [vmem:[%s3877_s1 + $0xe] sm:$0x3] }
  0x43   : > { %v646_v30 = vsel %vm3172_vm7, %v644_v23, %v645_v1  ;;  %v990_v36 = vshrl.u32 %v3182_v18, 16  ;;  %v429_v40 = vpack.c.b16 %v416_v19, %v415_v9  ;;  %v393_v41 = vrot.slane %v392_v12, 4  ;;  %v2647_v1 = vld [vmem:[%s3013_s9 + $0x24] sm:$0xff]  ;;  %v2627_v23 = vld [vmem:[%s3877_s1 + $0x10] sm:$0x3] }
  0x44   : > { %v699_v35 = vunpack.c.l.b16 %v646_v30  ;;  %v407_v43 = vrot.slane %v405_v3, 5  ;;  %v309_v45 = vshll.u32 %v3188_v25, 16  ;;  %v403_v48 = vrot.slane %v402_v28, 4  ;;  %v2569_v28 = vld [vmem:[%s3877_s1 + $0xc] sm:$0x3] }
  0x45   : > { %v296_v49 = vor.u32 %v295_v21, %v292_v16  ;;  %v306_v51 = vor.u32 %v305_v26, %v3190_v22  ;;  %v979_v58 = vrot.slane %v977_v32, 4  ;;  %v982_v59 = vrot.slane %v980_v33, 5 }
  0x46   : > { %v3201_v53 = vpack.c.b16 %v699_v35, %v698_v29  ;;  %v988_v61 = vrot.slane %v986_v34, 5  ;;  %v992_v62 = vrot.slane %v990_v36, 4  ;;  %v1455_v63 = vsel %vm460_vm0, %v2534_v55, 0 }
  0x47   : > { %1464 = vmatpush.bf16.msra.mxu2 %v1455_v63  ;;  %v398_v3 = vsel %vm3055_vm4, %v393_v41, %v3165_v60  ;;  %v408_v6 = vsel %vm3055_vm4, %v403_v48, %v407_v43  ;;  %v297_v7 = vrot.slane %v296_v49, 4  ;;  %v307_v9 = vrot.slane %v306_v51, 4  ;;  %v3244_v48 = vld [vmem:[%s3013_s9 + $0x18] sm:$0xf] }
  0x48   : > { %v983_v12 = vor.u32 %v982_v59, %v979_v58  ;;  %v993_v16 = vor.u32 %v992_v62, %v988_v61  ;;  %v996_v19 = vshll.u32 %v3209_v0, 16  ;;  %v1617_v60 = vsel %vm460_vm0, %v2569_v28, 0 }
  0x49   : > { %v2425_v21 = vrot.slane %v3071_v56, 9  ;;  %1626 = vmatpush.bf16.msra.mxu3 %v1617_v60  ;;  %v1927_v26 = vsel %vm460_vm0, %v2610_v20, 0  ;;  %v2109_v29 = vsel %vm460_vm0, %v2627_v23, 0  ;;  %v425_v30 = vunpack.c.l.b16 %v398_v3  ;;  %v3264_v60 = vld [vmem:[%s3013_s9 + $0x20] sm:$0x1] }
  0x4a   : > { %v426_v32 = vunpack.c.l.b16 %v408_v6  ;;  %1936 = vmatpush.bf16.msra.mxu0 %v1927_v26  ;;  %2118 = vmatpush.bf16.msra.mxu1 %v2109_v29  ;;  %v649_v33 = vrot.slane %v3077_v4, 5  ;;  %v652_v34 = vrot.slane %v3083_v10, 5  ;;  %v302_v56 = vsel %vm3055_vm4, %v297_v7, %v3190_v22  ;;  %v3247_v4 = vld [vmem:[%s3013_s9 + $0x1c] sm:$0xf] }
  0x4b   : > { %v984_v35 = vrot.slane %v983_v12, 4  ;;  %v994_v36 = vrot.slane %v993_v16, 4  ;;  %v417_v49 = vunpack.c.l.b16 %v302_v56  ;;  %v1001_v62 = vshrl.u32 %v3244_v48, 16 }
  0x4c   : > { %v650_v43 = vsel %vm3172_vm7, %v2425_v21, %v649_v33  ;;  %v434_v10 = vpack.c.b16 %v426_v32, %v425_v30  ;;  %v1004_v63 = vshll.u32 %v3244_v48, 16  ;;  %v1014_v3 = vshrl.u32 %v3247_v4, 16 }
  0x4d   : > { %2382 = vmatmul.msk.bf16.gmra.mxu2 %vm435_vm1, %v433_v8  ;;  %v311_v8 = vrot.slane %v309_v45, 5  ;;  %v651_v45 = vrot.slane %v649_v33, 4  ;;  %v989_v55 = vsel %vm3055_vm4, %v984_v35, %v988_v61  ;;  %v1003_v12 = vrot.slane %v1001_v62, 4  ;;  %v3276_v35 = vld [vmem:[%s3013_s9 + $0x24] sm:$0xf] }
  0x4e   : > { %v1170_v61 = vunpack.c.l.b16 %v989_v55  ;;  %v1006_v16 = vrot.slane %v1004_v63, 5  ;;  %v1016_v28 = vrot.slane %v1014_v3, 4  ;;  %v2426_v23 = vrot.slane %v3106_v42, 9  ;;  %v2653_v63 = vld [vmem:[%s3013_s9 + $0x18] sm:$0xff] }
  0x4f   : > { %2423 = vmatmul.msk.bf16.gmra.mxu3 %vm435_vm1, %v2651_v46  ;;  %v312_v41 = vsel %vm3055_vm4, %v307_v9, %v311_v8  ;;  %v700_v46 = vunpack.c.l.b16 %v650_v43  ;;  %v653_v22 = vsel %vm3172_vm7, %v651_v45, %v652_v34  ;;  %v2652_v8 = vld [vmem:[%s3013_s9 + $0xc] sm:$0xff]  ;;  %v656_v21 = vrot.slane %v3116_v57, 5 }
  0x50   : > { %2378 = vmatmul.msk.bf16.gmra.mxu0 %vm435_vm1, %v429_v40  ;;  %2419 = vmatmul.msk.bf16.gmra.mxu1 %vm435_vm1, %v2647_v1  ;;  %v998_v40 = vrot.slane %v996_v19, 5  ;;  %v418_v51 = vunpack.c.l.b16 %v312_v41  ;;  %v701_v59 = vunpack.c.l.b16 %v653_v22  ;;  %v1010_v1 = vshll.u32 %v3247_v4, 16 }
  0x51   : > { %v659_v26 = vrot.slane %v3126_v2, 5  ;;  %v1007_v29 = vor.u32 %v1006_v16, %v1003_v12  ;;  %v1020_v32 = vshll.u32 %v3264_v60, 16  ;;  %v657_v33 = vsel %vm3172_vm7, %v2426_v23, %v656_v21 }
  0x52   : > { %v999_v58 = vsel %vm3055_vm4, %v994_v36, %v998_v40  ;;  %v3259_v6 = vpack.c.b16 %v701_v59, %v700_v46  ;;  %v430_v7 = vpack.c.b16 %v418_v51, %v417_v49  ;;  %v1012_v19 = vrot.slane %v1010_v1, 5  ;;  %v3281_v36 = vld [vmem:[%s3013_s9 + $0x28] sm:$0xf] }
  0x53   : > { %v1171_v9 = vunpack.c.l.b16 %v999_v58  ;;  %v658_v34 = vrot.slane %v656_v21, 4  ;;  %v702_v56 = vunpack.c.l.b16 %v657_v33  ;;  %v1008_v57 = vrot.slane %v1007_v29, 4 }
  0x54   : > { %v1017_v30 = vor.u32 %v1016_v28, %v1012_v19  ;;  %v1022_v40 = vrot.slane %v1020_v32, 5  ;;  %v1025_v43 = vshrl.u32 %v3276_v35, 16  ;;  %v1028_v46 = vshll.u32 %v3276_v35, 16 }
  0x55   : > { %v1186_v20 = vpack.c.b16 %v1171_v9, %v1170_v61  ;;  %v660_v42 = vsel %vm3172_vm7, %v658_v34, %v659_v26  ;;  %v1038_v49 = vshrl.u32 %v3281_v36, 16  ;;  %v1013_v22 = vsel %vm3055_vm4, %v1008_v57, %v1012_v19 }
  0x56   : > { %v1018_v2 = vrot.slane %v1017_v30, 4  ;;  %v703_v41 = vunpack.c.l.b16 %v660_v42  ;;  %v1027_v55 = vrot.slane %v1025_v43, 4  ;;  %v1030_v58 = vrot.slane %v1028_v46, 5  ;;  %v2654_v43 = vld [vmem:[%s3013_s9 + $0x24] sm:$0xff] }
  0x57   : > { %v1040_v62 = vrot.slane %v1038_v49, 4  ;;  %v1172_v1 = vunpack.c.l.b16 %v1013_v22  ;;  %v2427_v16 = vrot.slane %v3149_v47, 9  ;;  %v666_v19 = vrot.slane %v3188_v25, 5  ;;  %v3311_v47 = vld [vmem:[%s3013_s9 + $0x30] sm:$0xf] }
  0x58   : > { %v3284_v45 = vpack.c.b16 %v703_v41, %v702_v56  ;;  %v1023_v51 = vsel %vm3055_vm4, %v1018_v2, %v1022_v40  ;;  %v1049_v56 = vshrl.u32 %v3311_v47, 16  ;;  %v1052_v42 = vshll.u32 %v3311_v47, 16 }
  0x59   : > { %v1173_v3 = vunpack.c.l.b16 %v1023_v51  ;;  %v3330_v51 = vld [vmem:[%s3013_s9 + $0x38] sm:$0x1] }
  0x5a   : > { %v1051_v46 = vrot.slane %v1049_v56, 4 }
  0x5b   : > { %v1187_v12 = vpack.c.b16 %v1173_v3, %v1172_v1  ;;  %v3337_v3 = vld [vmem:[%s3013_s9 + $0x3c] sm:$0xf] }
  0x5d   : > { %2383 = vmatmul.msk.bf16.gmra.mxu2 %vm435_vm1, %v434_v10  ;;  %v1034_v10 = vshll.u32 %v3281_v36, 16 }
  0x5f   : > { %2500 = vmatmul.msk.bf16.vlgmr.msrb.gmra.mxu3 %vm435_vm1, %v2652_v8  ;;  %v1036_v59 = vrot.slane %v1034_v10, 5  ;;  %v1031_v8 = vor.u32 %v1030_v58, %v1027_v55  ;;  %v1054_v10 = vrot.slane %v1052_v42, 5  ;;  %v3361_v42 = vld [vmem:[%s3013_s9 + $0x48] sm:$0xf] }
  0x60   : > { %2379 = vmatmul.msk.bf16.gmra.mxu0 %vm435_vm1, %v430_v7  ;;  %2518 = vmatmul.msk.bf16.vlgmr.msrb.gmra.mxu1 %vm435_vm1, %v1186_v20  ;;  %v3297_v7 = vld [vmem:[%s3013_s9 + $0x2c] sm:$0x1] }
  0x61   : > { %v1041_v61 = vor.u32 %v1040_v62, %v1036_v59  ;;  %v1044_v9 = vshll.u32 %v3297_v7, 16  ;;  %v1032_v21 = vrot.slane %v1031_v8, 4  ;;  %v1055_v58 = vor.u32 %v1054_v10, %v1051_v46  ;;  %v3340_v8 = vld [vmem:[%s3013_s9 + $0x40] sm:$0xf] }
  0x62   : > { %v1068_v62 = vshll.u32 %v3330_v51, 16  ;;  %v1100_v46 = vshll.u32 %v3361_v42, 16 }
  0x63   : > { %v1042_v26 = vrot.slane %v1041_v61, 4  ;;  %v1046_v29 = vrot.slane %v1044_v9, 5  ;;  %v1037_v25 = vsel %vm3055_vm4, %v1032_v21, %v1036_v59 }
  0x64   : > { %v1174_v40 = vunpack.c.l.b16 %v1037_v25  ;;  %v1070_v1 = vrot.slane %v1068_v62, 5 }
  0x65   : > { %v1047_v33 = vsel %vm3055_vm4, %v1042_v26, %v1046_v29 }
  0x66   : > { %v1175_v41 = vunpack.c.l.b16 %v1047_v33 }
  0x68   : > { %v1188_v55 = vpack.c.b16 %v1175_v41, %v1174_v40 }
  0x6d   : > { %2433 = vmatmul.msk.bf16.vlgmr.msrb.gmra.mxu2 %vm435_vm1, %v3201_v53  ;;  %v663_v53 = vrot.slane %v3154_v50, 5  ;;  %v3314_v50 = vld [vmem:[%s3013_s9 + $0x34] sm:$0xf] }
  0x6e   : > { %v1058_v57 = vshll.u32 %v3314_v50, 16  ;;  %v1062_v2 = vshrl.u32 %v3314_v50, 16 }
  0x6f   : > { %2501 = vmatmul.msk.bf16.gmra.mxu3 %vm435_vm1, %v2653_v63  ;;  %v664_v28 = vsel %vm3172_vm7, %v2427_v16, %v663_v53  ;;  %v665_v23 = vrot.slane %v663_v53, 4  ;;  %v1076_v16 = vshll.u32 %v3337_v3, 16  ;;  %v1082_v53 = vshll.u32 %v3340_v8, 16 }
  0x70   : > { %2509 = vmatmul.msk.bf16.vlgmr.msrb.gmra.mxu0 %vm435_vm1, %v1186_v20  ;;  %2519 = vmatmul.msk.bf16.gmra.mxu1 %vm435_vm1, %v1187_v12  ;;  %v704_v20 = vunpack.c.l.b16 %v664_v28  ;;  %v1060_v49 = vrot.slane %v1058_v57, 5  ;;  %v1064_v22 = vrot.slane %v1062_v2, 4  ;;  %v2655_v28 = vld [vmem:[%s3013_s9 + $0x30] sm:$0xff]  ;;  %v3364_v57 = vld [vmem:[%s3013_s9 + $0x4c] sm:$0xf] }
  0x71   : > { %v667_v30 = vsel %vm3172_vm7, %v665_v23, %v666_v19  ;;  %v1086_v19 = vshrl.u32 %v3340_v8, 16  ;;  %v1078_v29 = vrot.slane %v1076_v16, 5  ;;  %v1106_v10 = vshll.u32 %v3364_v57, 16 }
  0x72   : > { %v705_v32 = vunpack.c.l.b16 %v667_v30  ;;  %v1065_v59 = vor.u32 %v1064_v22, %v1060_v49  ;;  %v670_v22 = vrot.slane %v3020_v14, 5 }
  0x73   : > { %v1088_v30 = vrot.slane %v1086_v19, 4 }
  0x74   : > { %v3320_v34 = vpack.c.b16 %v705_v32, %v704_v20  ;;  %v1066_v63 = vrot.slane %v1065_v59, 4  ;;  %v1084_v20 = vrot.slane %v1082_v53, 5  ;;  %v3354_v32 = vld [vmem:[%s3013_s9 + $0x44] sm:$0x1]  ;;  %v2428_v59 = vrot.slane %v3017_v13, 9 }
  0x75   : > { %v3381_v53 = vld [vmem:[%s3013_s9 + $0x50] sm:$0x1] }
  0x76   : > { %v1071_v9 = vsel %vm3055_vm4, %v1066_v63, %v1070_v1  ;;  %v1089_v56 = vor.u32 %v1088_v30, %v1084_v20  ;;  %v1108_v63 = vrot.slane %v1106_v10, 5  ;;  %v671_v13 = vsel %vm3172_vm7, %v2428_v59, %v670_v22 }
  0x77   : > { %v1177_v21 = vunpack.c.l.b16 %v1071_v9  ;;  %v672_v9 = vrot.slane %v670_v22, 4 }
  0x78   : > { %v1090_v40 = vrot.slane %v1089_v56, 4 }
  0x7d   : > { %2434 = vmatmul.msk.bf16.gmra.mxu2 %vm435_vm1, %v3259_v6  ;;  %v1056_v6 = vrot.slane %v1055_v58, 4 }
  0x7f   : > { %2502 = vmatmul.msk.bf16.gmra.mxu3 %vm435_vm1, %v2654_v43  ;;  %v1061_v61 = vsel %vm3055_vm4, %v1056_v6, %v1060_v49  ;;  %v1097_v43 = vshrl.u32 %v3361_v42, 16  ;;  %v1110_v49 = vshrl.u32 %v3364_v57, 16  ;;  %v1102_v6 = vrot.slane %v1100_v46, 5 }
  0x80   : > { %2510 = vmatmul.msk.bf16.gmra.mxu0 %vm435_vm1, %v1187_v12  ;;  %2520 = vmatmul.msk.bf16.gmra.mxu1 %vm435_vm1, %v1188_v55  ;;  %v1073_v12 = vshrl.u32 %v3337_v3, 16  ;;  %v1176_v23 = vunpack.c.l.b16 %v1061_v61  ;;  %v2656_v61 = vld [vmem:[%s3013_s9 + $0x3c] sm:$0xff] }
  0x81   : > { %v1099_v62 = vrot.slane %v1097_v43, 4  ;;  %v1112_v1 = vrot.slane %v1110_v49, 4 }
  0x82   : > { %v1075_v26 = vrot.slane %v1073_v12, 4  ;;  %v1189_v25 = vpack.c.b16 %v1177_v21, %v1176_v23  ;;  %v673_v12 = vrot.slane %v3023_v15, 5  ;;  %v1116_v21 = vshll.u32 %v3381_v53, 16 }
  0x83   : > { %v1113_v23 = vor.u32 %v1112_v1, %v1108_v63  ;;  %v2657_v1 = vld [vmem:[%s3013_s9 + $0x48] sm:$0xff] }
  0x84   : > { %v1079_v33 = vor.u32 %v1078_v29, %v1075_v26  ;;  %v674_v15 = vsel %vm3172_vm7, %v672_v9, %v673_v12  ;;  %v706_v26 = vunpack.c.l.b16 %v671_v13  ;;  %v1118_v56 = vrot.slane %v1116_v21, 5  ;;  %v3411_v13 = vld [vmem:[%s3013_s9 + $0x5c] sm:$0x1] }
  0x86   : > { %v1080_v2 = vrot.slane %v1079_v33, 4  ;;  %v1114_v33 = vrot.slane %v1113_v23, 4 }
  0x88   : > { %v1119_v46 = vsel %vm3055_vm4, %v1114_v33, %v1118_v56 }
  0x8d   : > { %2435 = vmatmul.msk.bf16.gmra.mxu2 %vm435_vm1, %v3284_v45  ;;  %v1092_v45 = vshll.u32 %v3354_v32, 16 }
  0x8f   : > { %2503 = vmatmul.msk.bf16.gmra.mxu3 %vm435_vm1, %v2655_v28  ;;  %v1094_v41 = vrot.slane %v1092_v45, 5  ;;  %v1103_v28 = vor.u32 %v1102_v6, %v1099_v62  ;;  %v3392_v45 = vld [vmem:[%s3013_s9 + $0x54] sm:$0xf] }
  0x90   : > { %2511 = vmatmul.msk.bf16.gmra.mxu0 %vm435_vm1, %v1188_v55  ;;  %2521 = vmatmul.msk.bf16.gmra.mxu1 %vm435_vm1, %v1189_v25  ;;  %v1085_v55 = vsel %vm3055_vm4, %v1080_v2, %v1084_v20  ;;  %v707_v20 = vunpack.c.l.b16 %v674_v15  ;;  %v3395_v2 = vld [vmem:[%s3013_s9 + $0x58] sm:$0xf]  ;;  %v1121_v10 = vshrl.u32 %v3392_v45, 16  ;;  %v1124_v49 = vshll.u32 %v3392_v45, 16 }
  0x91   : > { %v1095_v58 = vsel %vm3055_vm4, %v1090_v40, %v1094_v41  ;;  %v1178_v14 = vunpack.c.l.b16 %v1085_v55  ;;  %v1104_v30 = vrot.slane %v1103_v28, 4  ;;  %v677_v41 = vrot.slane %v3051_v38, 5 }
  0x92   : > { %v1179_v16 = vunpack.c.l.b16 %v1095_v58  ;;  %v718_v40 = vpack.c.b16 %v707_v20, %v706_v26  ;;  %v1130_v22 = vshll.u32 %v3395_v2, 16  ;;  %v1134_v55 = vshrl.u32 %v3395_v2, 16 }
  0x93   : > { %v1109_v43 = vsel %vm3055_vm4, %v1104_v30, %v1108_v63  ;;  %v2429_v58 = vrot.slane %v3048_v37, 9  ;;  %v679_v62 = vrot.slane %v677_v41, 4  ;;  %v680_v38 = vrot.slane %v3067_v54, 5 }
  0x94   : > { %v1180_v6 = vunpack.c.l.b16 %v1109_v43  ;;  %v1181_v63 = vunpack.c.l.b16 %v1119_v46  ;;  %v1126_v9 = vrot.slane %v1124_v49, 5  ;;  %v1132_v12 = vrot.slane %v1130_v22, 5 }
  0x95   : > { %v678_v21 = vsel %vm3172_vm7, %v2429_v58, %v677_v41  ;;  %v681_v54 = vsel %vm3172_vm7, %v679_v62, %v680_v38  ;;  %v1140_v30 = vshll.u32 %v3411_v13, 16  ;;  %v684_v38 = vrot.slane %v3096_v31, 5 }
  0x96   : > { %v1191_v15 = vpack.c.b16 %v1181_v63, %v1180_v6  ;;  %v708_v56 = vunpack.c.l.b16 %v678_v21 }
  0x97   : > { %v1142_v46 = vrot.slane %v1140_v30, 5  ;;  %v686_v31 = vrot.slane %v684_v38, 4 }
  0x9d   : > { %2436 = vmatmul.msk.bf16.gmra.mxu2 %vm435_vm1, %v3320_v34  ;;  %v589_v19 = vpop.f32.mrf.mxu1  ;;  %v1190_v34 = vpack.c.b16 %v1179_v16, %v1178_v14  ;;  %v1136_v14 = vrot.slane %v1134_v55, 4 }
  0x9f   : > { %2504 = vmatmul.msk.bf16.gmra.mxu3 %vm435_vm1, %v2656_v61  ;;  %v1123_v61 = vrot.slane %v1121_v10, 4 }
  0xa0   : > { %2512 = vmatmul.msk.bf16.gmra.mxu0 %vm435_vm1, %v1189_v25  ;;  %2522 = vmatmul.msk.bf16.gmra.mxu1 %vm435_vm1, %v1190_v34 }
  0xa1   : > { %v1127_v20 = vor.u32 %v1126_v9, %v1123_v61 }
  0xa2   : > { %v609_v29 = vpop.f32.mrf.mxu3 }
  0xa3   : > { %v1128_v41 = vrot.slane %v1127_v20, 4 }
  0xa5   : > { %v591_v25 = vpop.f32.mrf.mxu1  ;;  %v1133_v6 = vsel %vm3055_vm4, %v1128_v41, %v1132_v12  ;;  %v3447_v41 = vld [vmem:[%s3013_s9 + $0x68] sm:$0x1] }
  0xaa   : > { %v611_v59 = vpop.f32.mrf.mxu3 }
  0xad   : > { %2437 = vmatmul.msk.bf16.gmra.mxu2 %vm435_vm1, %v718_v40  ;;  %v473_v16 = vpop.f32.mrf.mxu0  ;;  %v594_v37 = vpop.f32.mrf.mxu1  ;;  %v709_v40 = vunpack.c.l.b16 %v681_v54 }
  0xae   : > { %v3413_v28 = vadd.f32 %v589_v19, %v473_v16  ;;  %v1137_v19 = vor.u32 %v1136_v14, %v1132_v12  ;;  %v2430_v16 = vrot.slane %v3086_v11, 9  ;;  %v1182_v12 = vunpack.c.l.b16 %v1133_v6 }
  0xaf   : > { %2505 = vmatmul.msk.bf16.gmra.mxu3 %vm435_vm1, %v2657_v1  ;;  %v719_v55 = vpack.c.b16 %v709_v40, %v708_v56  ;;  %v1350_v11 = vrot.slane %v3182_v18, 5  ;;  %v1164_v6 = vshll.u32 %v3447_v41, 16 }
  0xb0   : > { %v493_v23 = vpop.f32.mrf.mxu2  ;;  %2513 = vmatmul.msk.bf16.gmra.mxu0 %vm435_vm1, %v1190_v34  ;;  %2523 = vmatmul.msk.bf16.gmra.mxu1 %vm435_vm1, %v1191_v15  ;;  %v1138_v43 = vrot.slane %v1137_v19, 4  ;;  %v2464_v34 = vld [vmem:[%s3013_s9 + $0x60] sm:$0xf] }
  0xb1   : > { %v3420_v26 = vadd.f32 %v609_v29, %v493_v23  ;;  %v3429_v29 = vld [vmem:[%s3013_s9 + $0x64] sm:$0xf]  ;;  %v1145_v1 = vshrl.u32 %v2464_v34, 16  ;;  %v687_v23 = vrot.slane %v3109_v44, 5  ;;  %v685_v44 = vsel %vm3172_vm7, %v2430_v16, %v684_v38 }
  0xb2   : > { %v614_v33 = vpop.f32.mrf.mxu3  ;;  %v1143_v63 = vsel %vm3055_vm4, %v1138_v43, %v1142_v46  ;;  %v1154_v61 = vshll.u32 %v3429_v29, 16  ;;  %v1158_v9 = vshrl.u32 %v3429_v29, 16  ;;  %v1166_v16 = vrot.slane %v1164_v6, 5 }
  0xb3   : > { %v1183_v21 = vunpack.c.l.b16 %v1143_v63  ;;  %v1147_v20 = vrot.slane %v1145_v1, 4  ;;  %v710_v63 = vunpack.c.l.b16 %v685_v44  ;;  %v694_v44 = vrot.slane %v3157_v52, 5 }
  0xb4   : > { %v1156_v30 = vrot.slane %v1154_v61, 5  ;;  %v1160_v56 = vrot.slane %v1158_v9, 4 }
  0xb5   : > { %v475_v10 = vpop.f32.mrf.mxu0  ;;  %v596_v58 = vpop.f32.mrf.mxu1 }
  0xb6   : > { %v3425_v49 = vadd.f32 %v591_v25, %v475_v10  ;;  %v1148_v25 = vshll.u32 %v2464_v34, 16  ;;  %v1192_v34 = vpack.c.b16 %v1183_v21, %v1182_v12  ;;  %v691_v12 = vrot.slane %v3135_v27, 5 }
  0xb7   : > { %v2431_v27 = vrot.slane %v3132_v24, 9 }
  0xb8   : > { %v495_v22 = vpop.f32.mrf.mxu2  ;;  %v1150_v19 = vrot.slane %v1148_v25, 5  ;;  %v1352_v25 = vrot.slane %v1350_v11, 4 }
  0xb9   : > { %v3431_v62 = vadd.f32 %v611_v59, %v495_v22  ;;  %v2658_v59 = vld [vmem:[%s3013_s9 + $0x54] sm:$0xff]  ;;  %v692_v24 = vsel %vm3172_vm7, %v2431_v27, %v691_v12 }
  0xba   : > { %v616_v14 = vpop.f32.mrf.mxu3  ;;  %v1151_v22 = vor.u32 %v1150_v19, %v1147_v20 }
  0xbc   : > { %v1152_v38 = vrot.slane %v1151_v22, 4 }
  0xbd   : > { %2438 = vmatmul.msk.bf16.gmra.mxu2 %vm435_vm1, %v719_v55  ;;  %v478_v54 = vpop.f32.mrf.mxu0  ;;  %v599_v46 = vpop.f32.mrf.mxu1  ;;  %v1161_v55 = vor.u32 %v1160_v56, %v1156_v30 }
  0xbe   : > { %v3444_v40 = vadd.f32 %v594_v37, %v478_v54  ;;  %v688_v37 = vsel %vm3172_vm7, %v686_v31, %v687_v23 }
  0xbf   : > { %2506 = vmatmul.msk.bf16.gmra.mxu3 %vm435_vm1, %v2658_v59  ;;  %v711_v1 = vunpack.c.l.b16 %v688_v37  ;;  %v1162_v9 = vrot.slane %v1161_v55, 4 }
  0xc0   : > { %v498_v43 = vpop.f32.mrf.mxu2  ;;  %2514 = vmatmul.msk.bf16.gmra.mxu0 %vm435_vm1, %v1191_v15  ;;  %2524 = vmatmul.msk.bf16.gmra.mxu1 %vm435_vm1, %v1192_v34  ;;  %v2526_v15 = vrot.slane %v3179_v17, 9  ;;  %v1157_v17 = vsel %vm3055_vm4, %v1152_v38, %v1156_v30  ;;  %v2659_v30 = vld [vmem:[%s3013_s9 + $0x60] sm:$0xff]  ;;  %v2545_v38 = vld [vmem:[%s3013_s9 + $0x18] sm:$0xf] }
  0xc1   : > { %v3451_v10 = vadd.f32 %v614_v33, %v498_v43  ;;  %v1353_v33 = vrot.slane %v3209_v0, 5  ;;  %v720_v54 = vpack.c.b16 %v711_v1, %v710_v63  ;;  %v1167_v0 = vsel %vm3055_vm4, %v1162_v9, %v1166_v16  ;;  %v2547_v16 = vld [vmem:[%s3013_s9 + $0x20] sm:$0x1] }
  0xc2   : > { %v619_v18 = vpop.f32.mrf.mxu3  ;;  %v1351_v20 = vsel %vm3172_vm7, %v2526_v15, %v1350_v11  ;;  %v1184_v37 = vunpack.c.l.b16 %v1157_v17  ;;  %v1185_v22 = vunpack.c.l.b16 %v1167_v0  ;;  %v2546_v15 = vld [vmem:[%s3013_s9 + $0x1c] sm:$0xf]  ;;  %v2007_v0 = vrot.slane %v2547_v16, 5 }
  0xc3   : > { %v1406_v19 = vunpack.c.l.b16 %v1351_v20  ;;  %v2004_v1 = vrot.slane %v2546_v15, 5  ;;  %v1688_v20 = vshll.u32 %v2545_v38, 16 }
  0xc5   : > { %v480_v61 = vpop.f32.mrf.mxu0  ;;  %v601_v23 = vpop.f32.mrf.mxu1  ;;  %v2006_v17 = vrot.slane %v2004_v1, 4 }
  0xc6   : > { %v3462_v59 = vadd.f32 %v596_v58, %v480_v61  ;;  %v1354_v58 = vsel %vm3172_vm7, %v1352_v25, %v1353_v33  ;;  %v1193_v61 = vpack.c.b16 %v1185_v22, %v1184_v37 }
  0xc7   : > { %v1407_v56 = vunpack.c.l.b16 %v1354_v58  ;;  %v1694_v58 = vshll.u32 %v2546_v15, 16  ;;  %v2008_v37 = vsel %vm3172_vm7, %v2006_v17, %v2007_v0 }
  0xc8   : > { %v500_v31 = vpop.f32.mrf.mxu2 }
  0xc9   : > { %v3465_v21 = vadd.f32 %v616_v14, %v500_v31  ;;  %v693_v14 = vrot.slane %v691_v12, 4  ;;  %v3479_v55 = vpack.c.b16 %v1407_v56, %v1406_v19  ;;  %v2619_v12 = vrot.slane %v2545_v38, 9 }
  0xca   : > { %v621_v43 = vpop.f32.mrf.mxu3  ;;  %v1698_v19 = vshrl.u32 %v2546_v15, 16 }
  0xcb   : > { %v695_v52 = vsel %vm3172_vm7, %v693_v14, %v694_v44 }
  0xcc   : > { %v713_v9 = vunpack.c.l.b16 %v695_v52  ;;  %v1700_v15 = vrot.slane %v1698_v19, 4  ;;  %v2061_v52 = vunpack.c.l.b16 %v2008_v37 }
  0xcd   : > { %2439 = vmatmul.msk.bf16.gmra.mxu2 %vm435_vm1, %v720_v54  ;;  %v483_v11 = vpop.f32.mrf.mxu0  ;;  %v604_v63 = vpop.f32.mrf.mxu1  ;;  %v1685_v54 = vshrl.u32 %v2545_v38, 16  ;;  %v2660_v38 = vld [vmem:[%s3013_s9 + $0x18] sm:$0xff] }
  0xce   : > { %v3481_v6 = vadd.f32 %v599_v46, %v483_v11  ;;  %v712_v46 = vunpack.c.l.b16 %v692_v24  ;;  %v1690_v11 = vrot.slane %v1688_v20, 5 }
  0xcf   : > { %2507 = vmatmul.msk.bf16.gmra.mxu3 %vm435_vm1, %v2659_v30  ;;  %v1687_v44 = vrot.slane %v1685_v54, 4  ;;  %v2005_v30 = vsel %vm3172_vm7, %v2619_v12, %v2004_v1  ;;  %v1704_v54 = vshll.u32 %v2547_v16, 16  ;;  %v2548_v16 = vld [vmem:[%s3013_s9 + $0x24] sm:$0xf] }
  0xd0   : > { %v503_v33 = vpop.f32.mrf.mxu2  ;;  %2515 = vmatmul.msk.bf16.gmra.mxu0 %vm435_vm1, %v1192_v34  ;;  %2525 = vmatmul.msk.bf16.gmra.mxu1 %vm435_vm1, %v1193_v61  ;;  %v721_v27 = vpack.c.b16 %v713_v9, %v712_v46  ;;  %v2060_v24 = vunpack.c.l.b16 %v2005_v30  ;;  %v2620_v30 = vrot.slane %v2548_v16, 9 }
  0xd1   : > { %v3489_v25 = vadd.f32 %v619_v18, %v503_v33  ;;  %v1696_v33 = vrot.slane %v1694_v58, 5  ;;  %v1691_v46 = vor.u32 %v1690_v11, %v1687_v44 }
  0xd2   : > { %v624_v31 = vpop.f32.mrf.mxu3  ;;  %v2076_v17 = vpack.c.b16 %v2061_v52, %v2060_v24  ;;  %v1709_v24 = vshrl.u32 %v2548_v16, 16  ;;  %v1712_v52 = vshll.u32 %v2548_v16, 16 }
  0xd3   : > { %v1701_v9 = vor.u32 %v1700_v15, %v1696_v33 }
  0xd4   : > { %v1711_v16 = vrot.slane %v1709_v24, 4 }
  0xd5   : > { %v485_v34 = vpop.f32.mrf.mxu0  ;;  %v606_v14 = vpop.f32.mrf.mxu1 }
  0xd6   : > { %v3495_v18 = vadd.f32 %v601_v23, %v485_v34  ;;  %v1692_v34 = vrot.slane %v1691_v46, 4 }
  0xd8   : > { %v505_v56 = vpop.f32.mrf.mxu2  ;;  %v1697_v15 = vsel %vm3055_vm4, %v1692_v34, %v1696_v33 }
  0xd9   : > { %v3501_v22 = vadd.f32 %v621_v43, %v505_v56  ;;  %v2549_v43 = vld [vmem:[%s3013_s9 + $0x28] sm:$0xf]  ;;  %v1702_v56 = vrot.slane %v1701_v9, 4  ;;  %v1878_v34 = vunpack.c.l.b16 %v1697_v15 }
  0xda   : > { %v626_v23 = vpop.f32.mrf.mxu3  ;;  %v2011_v58 = vrot.slane %v2549_v43, 5  ;;  %v1722_v46 = vshrl.u32 %v2549_v43, 16 }
  0xdc   : > { %v2013_v37 = vrot.slane %v2011_v58, 4 }
  0xdd   : > { %2440 = vmatmul.msk.bf16.gmra.mxu2 %vm435_vm1, %v721_v27  ;;  %v488_v1 = vpop.f32.mrf.mxu0  ;;  %v3508_v20 = vpop.f32.mrf.mxu1  ;;  %v1706_v27 = vrot.slane %v1704_v54, 5 }
  0xde   : > { %v3505_v12 = vadd.f32 %v604_v63, %v488_v1  ;;  %3886 = vst [vmem:[#allocation5_spill] sm:$0xff] %v3508_v20  ;;  %v2550_v63 = vld [vmem:[%s3013_s9 + $0x2c] sm:$0x1] }
  0xdf   : > { %2602 = vmatmul.msk.bf16.vlgmr.msra.gmra.mxu3 %vm435_vm1, %v2660_v38  ;;  %v2014_v11 = vrot.slane %v2550_v63, 5  ;;  %v1718_v38 = vshll.u32 %v2549_v43, 16  ;;  %v1714_v43 = vrot.slane %v1712_v52, 5  ;;  %v1728_v24 = vshll.u32 %v2550_v63, 16 }
  0xe0   : > { %v508_v0 = vpop.f32.mrf.mxu2  ;;  %2516 = vmatmul.msk.bf16.gmra.mxu0 %vm435_vm1, %v1193_v61  ;;  %2628 = vmatmul.msk.bf16.vlgmr.msra.gmra.mxu1 %vm435_vm1, %v2076_v17  ;;  %v1707_v61 = vsel %vm3055_vm4, %v1702_v56, %v1706_v27  ;;  %v2012_v17 = vsel %vm3172_vm7, %v2620_v30, %v2011_v58  ;;  %v1357_v27 = vrot.slane %v3247_v4, 5  ;;  %v1360_v58 = vrot.slane %v3264_v60, 5  ;;  %v2661_v30 = vld [vmem:[%s3013_s9 + $0x24] sm:$0xff] }
  0xe1   : > { %v3511_v19 = vadd.f32 %v624_v31, %v508_v0  ;;  %v2015_v33 = vsel %vm3172_vm7, %v2013_v37, %v2014_v11  ;;  %v1879_v56 = vunpack.c.l.b16 %v1707_v61  ;;  %v2062_v20 = vunpack.c.l.b16 %v2012_v17  ;;  %v2551_v17 = vld [vmem:[%s3013_s9 + $0x30] sm:$0xf] }
  0xe2   : > { %v920_v44 = vpop.f32.mrf.mxu3  ;;  %v2527_v37 = vrot.slane %v3244_v48, 9  ;;  %v1359_v4 = vrot.slane %v1357_v27, 4  ;;  %v1715_v15 = vor.u32 %v1714_v43, %v1711_v16  ;;  %v1733_v16 = vshrl.u32 %v2551_v17, 16 }
  0xe3   : > { %3887 = vst [vmem:[#allocation6_spill] sm:$0xff] %v3511_v19  ;;  %v1736_v43 = vshll.u32 %v2551_v17, 16 }
  0xe4   : > { %v1358_v48 = vsel %vm3172_vm7, %v2527_v37, %v1357_v27  ;;  %v1361_v63 = vsel %vm3172_vm7, %v1359_v4, %v1360_v58 }
  0xe5   : > { %v490_v31 = vpop.f32.mrf.mxu0  ;;  %v3523_v1 = vpop.f32.mrf.mxu1 }
  0xe6   : > { %v3521_v9 = vadd.f32 %v606_v14, %v490_v31  ;;  %3888 = vst [vmem:[#allocation7_spill] sm:$0xff] %v3523_v1  ;;  %v1720_v14 = vrot.slane %v1718_v38, 5  ;;  %v1724_v31 = vrot.slane %v1722_v46, 4  ;;  %v2063_v1 = vunpack.c.l.b16 %v2015_v33  ;;  %v2552_v38 = vld [vmem:[%s3013_s9 + $0x34] sm:$0xf] }
  0xe7   : > { %v2018_v60 = vrot.slane %v2552_v38, 5  ;;  %v1730_v33 = vrot.slane %v1728_v24, 5  ;;  %v1742_v37 = vshll.u32 %v2552_v38, 16  ;;  %v1746_v4 = vshrl.u32 %v2552_v38, 16 }
  0xe8   : > { %v510_v54 = vpop.f32.mrf.mxu2  ;;  %v1725_v61 = vor.u32 %v1724_v31, %v1720_v14  ;;  %v2077_v52 = vpack.c.b16 %v2063_v1, %v2062_v20  ;;  %v1716_v20 = vrot.slane %v1715_v15, 4  ;;  %v1735_v15 = vrot.slane %v1733_v16, 4 }
  0xe9   : > { %v3529_v0 = vadd.f32 %v626_v23, %v510_v54  ;;  %v1894_v23 = vpack.c.b16 %v1879_v56, %v1878_v34  ;;  %v2553_v56 = vld [vmem:[%s3013_s9 + $0x38] sm:$0x1]  ;;  %v2528_v38 = vrot.slane %v3276_v35, 9 }
  0xea   : > { %v922_v19 = vpop.f32.mrf.mxu3  ;;  %v1726_v1 = vrot.slane %v1725_v61, 4  ;;  %v1721_v58 = vsel %vm3055_vm4, %v1716_v20, %v1720_v14  ;;  %v1738_v61 = vrot.slane %v1736_v43, 5  ;;  %v3891_v39 = vld [vmem:[#allocation6_spill] sm:$0xff] }
  0xeb   : > { %3889 = vst [vmem:[#allocation8_spill] sm:$0xff] %v3529_v0 }
  0xec   : > { %v1739_v16 = vor.u32 %v1738_v61, %v1735_v15 }
  0xed   : > { %2535 = vmatmul.msk.bf16.vlgmr.msra.gmra.mxu2 %vm435_vm1, %v3479_v55  ;;  %v1230_v11 = vpop.f32.mrf.mxu0  ;;  %v3538_v54 = vpop.f32.mrf.mxu1 }
  0xee   : > { %3890 = vst [vmem:[#allocation9_spill] sm:$0xff] %v3538_v54  ;;  %v1409_v54 = vunpack.c.l.b16 %v1361_v63  ;;  %v1880_v63 = vunpack.c.l.b16 %v1721_v58  ;;  %v1752_v58 = vshll.u32 %v2553_v56, 16 }
  0xef   : > { %2603 = vmatmul.msk.bf16.gmra.mxu3 %vm435_vm1, %v2661_v30  ;;  %v1408_v30 = vunpack.c.l.b16 %v1358_v48 }
  0xf0   : > { %v758_v46 = vpop.f32.mrf.mxu2  ;;  %2611 = vmatmul.msk.bf16.vlgmr.msra.gmra.mxu0 %vm435_vm1, %v1894_v23  ;;  %2629 = vmatmul.msk.bf16.gmra.mxu1 %vm435_vm1, %v2077_v52  ;;  %v2621_v23 = vrot.slane %v2551_v17, 9  ;;  %v1364_v17 = vrot.slane %v3281_v36, 5 }
  0xf1   : > { %v798_v55 = vadd.f32 %v758_v46, %v3413_v28  ;;  %v2020_v28 = vrot.slane %v2018_v60, 4  ;;  %v2021_v46 = vrot.slane %v2553_v56, 5  ;;  %v1423_v48 = vpack.c.b16 %v1409_v54, %v1408_v30  ;;  %v2662_v54 = vld [vmem:[%s3013_s9 + $0x30] sm:$0xff] }
  0xf2   : > { %v925_v31 = vpop.f32.mrf.mxu3 }
  0xf3   : > { %v960_v34 = vadd.f32 %v920_v44, %v798_v55  ;;  %v1731_v44 = vsel %vm3055_vm4, %v1726_v1, %v1730_v33  ;;  %v2022_v55 = vsel %vm3172_vm7, %v2020_v28, %v2021_v46  ;;  %v1744_v1 = vrot.slane %v1742_v37, 5 }
  0xf4   : > { %v1881_v20 = vunpack.c.l.b16 %v1731_v44  ;;  %v1748_v33 = vrot.slane %v1746_v4, 4  ;;  %v2065_v43 = vunpack.c.l.b16 %v2022_v55  ;;  %v1366_v28 = vrot.slane %v1364_v17, 4  ;;  %v2555_v4 = vld [vmem:[%s3013_s9 + $0x40] sm:$0xf] }
  0xf5   : > { %v3550_v0 = vadd.f32 %v1230_v11, %v960_v34  ;;  %v1232_v27 = vpop.f32.mrf.mxu0  ;;  %v3556_v52 = vpop.f32.mrf.mxu1  ;;  %v2019_v11 = vsel %vm3172_vm7, %v2621_v23, %v2018_v60  ;;  %v1367_v60 = vrot.slane %v3297_v7, 5  ;;  %v1740_v44 = vrot.slane %v1739_v16, 4 }
  0xf6   : > { %v2064_v36 = vunpack.c.l.b16 %v2019_v11  ;;  %v1749_v35 = vor.u32 %v1748_v33, %v1744_v1  ;;  %v2025_v11 = vrot.slane %v2555_v4, 5  ;;  %v1754_v55 = vrot.slane %v1752_v58, 5 }
  0xf7   : > { %v1368_v15 = vsel %vm3172_vm7, %v1366_v28, %v1367_v60  ;;  %v1770_v60 = vshrl.u32 %v2555_v4, 16 }
  0xf8   : > { %v760_v24 = vpop.f32.mrf.mxu2  ;;  %v2078_v37 = vpack.c.b16 %v2065_v43, %v2064_v36  ;;  %v2027_v36 = vrot.slane %v2025_v11, 4 }
  0xf9   : > { %v799_v14 = vadd.f32 %v760_v24, %v3425_v49  ;;  %v1895_v49 = vpack.c.b16 %v1881_v20, %v1880_v63  ;;  %v2554_v24 = vld [vmem:[%s3013_s9 + $0x3c] sm:$0xf]  ;;  %v1745_v63 = vsel %vm3055_vm4, %v1740_v44, %v1744_v1  ;;  %v2556_v20 = vld [vmem:[%s3013_s9 + $0x44] sm:$0x1]  ;;  %v1371_v1 = vrot.slane %v3314_v50, 5 }
  0xfa   : > { %v927_v23 = vpop.f32.mrf.mxu3  ;;  %v2622_v16 = vrot.slane %v2554_v24, 9  ;;  %v2028_v43 = vrot.slane %v2556_v20, 5 }
  0xfb   : > { %v961_v34 = vadd.f32 %v922_v19, %v799_v14  ;;  %v1365_v19 = vsel %vm3172_vm7, %v2528_v38, %v1364_v17  ;;  %v1750_v17 = vrot.slane %v1749_v35, 4  ;;  %v1757_v38 = vshrl.u32 %v2554_v24, 16 }
  0xfc   : > { %v1410_v56 = vunpack.c.l.b16 %v1365_v19  ;;  %v1882_v35 = vunpack.c.l.b16 %v1745_v63  ;;  %v1373_v63 = vrot.slane %v1371_v1, 4 }
  0xfd   : > { %2536 = vmatmul.msk.bf16.gmra.mxu2 %vm435_vm1, %v1423_v48  ;;  %v3568_v46 = vadd.f32 %v1232_v27, %v961_v34  ;;  %v1235_v30 = vpop.f32.mrf.mxu0  ;;  %v3575_v61 = vpop.f32.mrf.mxu1  ;;  %v1411_v48 = vunpack.c.l.b16 %v1368_v15  ;;  %v1760_v34 = vshll.u32 %v2554_v24, 16  ;;  %v1759_v44 = vrot.slane %v1757_v38, 4 }
  0xff   : > { %2604 = vmatmul.msk.bf16.gmra.mxu3 %vm435_vm1, %v2662_v54  ;;  %v1424_v54 = vpack.c.b16 %v1411_v48, %v1410_v56  ;;  %v2529_v48 = vrot.slane %v3311_v47, 9 }
 0x100   : > { %v763_v7 = vpop.f32.mrf.mxu2  ;;  %2612 = vmatmul.msk.bf16.gmra.mxu0 %vm435_vm1, %v1895_v49  ;;  %2630 = vmatmul.msk.bf16.gmra.mxu1 %vm435_vm1, %v2078_v37  ;;  %v1762_v37 = vrot.slane %v1760_v34, 5  ;;  %v2663_v34 = vld [vmem:[%s3013_s9 + $0x3c] sm:$0xff] }
 0x101   : > { %v800_v27 = vadd.f32 %v763_v7, %v3444_v40  ;;  %v1766_v40 = vshll.u32 %v2555_v4, 16  ;;  %v2026_v7 = vsel %vm3172_vm7, %v2622_v16, %v2025_v11 }
 0x102   : > { %v930_v33 = vpop.f32.mrf.mxu3  ;;  %v2066_v50 = vunpack.c.l.b16 %v2026_v7  ;;  %v1763_v11 = vor.u32 %v1762_v37, %v1759_v44  ;;  %v2557_v44 = vld [vmem:[%s3013_s9 + $0x48] sm:$0xf] }
 0x103   : > { %v962_v14 = vadd.f32 %v925_v31, %v800_v27  ;;  %v1755_v31 = vsel %vm3055_vm4, %v1750_v17, %v1754_v55  ;;  %v1768_v24 = vrot.slane %v1766_v40, 5  ;;  %v1772_v27 = vrot.slane %v1770_v60, 4  ;;  %v2558_v40 = vld [vmem:[%s3013_s9 + $0x4c] sm:$0xf] }
 0x104   : > { %v1883_v15 = vunpack.c.l.b16 %v1755_v31  ;;  %v1374_v55 = vrot.slane %v3330_v51, 5  ;;  %v1372_v51 = vsel %vm3172_vm7, %v2529_v48, %v1371_v1  ;;  %v2559_v1 = vld [vmem:[%s3013_s9 + $0x50] sm:$0x1] }
 0x105   : > { %v3585_v28 = vadd.f32 %v1235_v30, %v962_v14  ;;  %v1237_v49 = vpop.f32.mrf.mxu0  ;;  %v3590_v19 = vpop.f32.mrf.mxu1  ;;  %v2029_v30 = vsel %vm3172_vm7, %v2027_v36, %v2028_v43  ;;  %v1773_v16 = vor.u32 %v1772_v27, %v1768_v24  ;;  %v1412_v7 = vunpack.c.l.b16 %v1372_v51 }
 0x106   : > { %v2067_v17 = vunpack.c.l.b16 %v2029_v30  ;;  %v1896_v38 = vpack.c.b16 %v1883_v15, %v1882_v35  ;;  %v1375_v47 = vsel %vm3172_vm7, %v1373_v63, %v1374_v55  ;;  %v2032_v35 = vrot.slane %v2558_v40, 5 }
 0x107   : > { %v1413_v30 = vunpack.c.l.b16 %v1375_v47  ;;  %v2623_v27 = vrot.slane %v2557_v44, 9  ;;  %v1784_v55 = vshll.u32 %v2557_v44, 16  ;;  %v1790_v63 = vshll.u32 %v2558_v40, 16 }
 0x108   : > { %v765_v58 = vpop.f32.mrf.mxu2  ;;  %v2079_v43 = vpack.c.b16 %v2067_v17, %v2066_v50  ;;  %v2035_v50 = vrot.slane %v2559_v1, 5  ;;  %v1781_v17 = vshrl.u32 %v2557_v44, 16 }
 0x109   : > { %v801_v4 = vadd.f32 %v765_v58, %v3462_v59  ;;  %v1776_v59 = vshll.u32 %v2556_v20, 16 }
 0x10a   : > { %v932_v14 = vpop.f32.mrf.mxu3  ;;  %v1783_v47 = vrot.slane %v1781_v17, 4  ;;  %v2560_v17 = vld [vmem:[%s3013_s9 + $0x54] sm:$0xf] }
 0x10b   : > { %v963_v56 = vadd.f32 %v927_v23, %v801_v4  ;;  %v1778_v58 = vrot.slane %v1776_v59, 5 }
 0x10d   : > { %2537 = vmatmul.msk.bf16.gmra.mxu2 %vm435_vm1, %v1424_v54  ;;  %v3601_v36 = vadd.f32 %v1237_v49, %v963_v56  ;;  %v1240_v23 = vpop.f32.mrf.mxu0  ;;  %v3608_v31 = vpop.f32.mrf.mxu1  ;;  %v1764_v54 = vrot.slane %v1763_v11, 4  ;;  %v1774_v49 = vrot.slane %v1773_v16, 4  ;;  %v2034_v56 = vrot.slane %v2032_v35, 4 }
 0x10e   : > { %v1794_v11 = vshrl.u32 %v2558_v40, 16  ;;  %v1792_v40 = vrot.slane %v1790_v63, 5 }
 0x10f   : > { %2605 = vmatmul.msk.bf16.gmra.mxu3 %vm435_vm1, %v2663_v34  ;;  %v1769_v15 = vsel %vm3055_vm4, %v1764_v54, %v1768_v24  ;;  %v2033_v24 = vsel %vm3172_vm7, %v2623_v27, %v2032_v35  ;;  %v1786_v54 = vrot.slane %v1784_v55, 5  ;;  %v2561_v55 = vld [vmem:[%s3013_s9 + $0x58] sm:$0xf] }
 0x110   : > { %v768_v60 = vpop.f32.mrf.mxu2  ;;  %2613 = vmatmul.msk.bf16.gmra.mxu0 %vm435_vm1, %v1896_v38  ;;  %2631 = vmatmul.msk.bf16.gmra.mxu1 %vm435_vm1, %v2079_v43  ;;  %v1425_v38 = vpack.c.b16 %v1413_v30, %v1412_v7  ;;  %v1884_v16 = vunpack.c.l.b16 %v1769_v15  ;;  %v2664_v30 = vld [vmem:[%s3013_s9 + $0x48] sm:$0xff] }
 0x111   : > { %v802_v20 = vadd.f32 %v768_v60, %v3481_v6  ;;  %v1779_v6 = vsel %vm3055_vm4, %v1774_v49, %v1778_v58  ;;  %v2036_v60 = vsel %vm3172_vm7, %v2034_v56, %v2035_v50  ;;  %v2068_v58 = vunpack.c.l.b16 %v2033_v24 }
 0x112   : > { %v935_v4 = vpop.f32.mrf.mxu3  ;;  %v1885_v59 = vunpack.c.l.b16 %v1779_v6  ;;  %v2069_v44 = vunpack.c.l.b16 %v2036_v60  ;;  %v1808_v24 = vshll.u32 %v2560_v17, 16 }
 0x113   : > { %v964_v37 = vadd.f32 %v930_v33, %v802_v20  ;;  %v1796_v20 = vrot.slane %v1794_v11, 4  ;;  %v2039_v11 = vrot.slane %v2561_v55, 5 }
 0x114   : > { %v1897_v7 = vpack.c.b16 %v1885_v59, %v1884_v16  ;;  %v2080_v6 = vpack.c.b16 %v2069_v44, %v2068_v58  ;;  %v1805_v59 = vshrl.u32 %v2560_v17, 16 }
 0x115   : > { %v3620_v48 = vadd.f32 %v1240_v23, %v964_v37  ;;  %v1242_v33 = vpop.f32.mrf.mxu0  ;;  %v3622_v43 = vpop.f32.mrf.mxu1  ;;  %v1378_v23 = vrot.slane %v3340_v8, 5  ;;  %v1381_v37 = vrot.slane %v3354_v32, 5  ;;  %v1787_v8 = vor.u32 %v1786_v54, %v1783_v47 }
 0x116   : > { %v1797_v50 = vor.u32 %v1796_v20, %v1792_v40  ;;  %v1814_v47 = vshll.u32 %v2561_v55, 16  ;;  %v1818_v54 = vshrl.u32 %v2561_v55, 16  ;;  %v2624_v20 = vrot.slane %v2560_v17, 9 }
 0x117   : > { %v1380_v15 = vrot.slane %v1378_v23, 4  ;;  %v1385_v17 = vrot.slane %v3364_v57, 5 }
 0x118   : > { %v770_v34 = vpop.f32.mrf.mxu2 }
 0x119   : > { %v803_v51 = vadd.f32 %v770_v34, %v3495_v18  ;;  %v2530_v18 = vrot.slane %v3337_v3, 9  ;;  %v1798_v34 = vrot.slane %v1797_v50, 4  ;;  %v1820_v50 = vrot.slane %v1818_v54, 4  ;;  %v2665_v54 = vld [vmem:[%s3013_s9 + $0x54] sm:$0xff] }
 0x11a   : > { %v937_v35 = vpop.f32.mrf.mxu3 }
 0x11b   : > { %v965_v49 = vadd.f32 %v932_v14, %v803_v51  ;;  %v1800_v14 = vshll.u32 %v2559_v1, 16  ;;  %v1379_v3 = vsel %vm3172_vm7, %v2530_v18, %v1378_v23  ;;  %v1382_v1 = vsel %vm3172_vm7, %v1380_v15, %v1381_v37  ;;  %v2562_v51 = vld [vmem:[%s3013_s9 + $0x5c] sm:$0x1] }
 0x11c   : > { %v2042_v58 = vrot.slane %v2562_v51, 5  ;;  %v1414_v44 = vunpack.c.l.b16 %v1379_v3  ;;  %v1415_v23 = vunpack.c.l.b16 %v1382_v1  ;;  %v1807_v18 = vrot.slane %v1805_v59, 4 }
 0x11d   : > { %2538 = vmatmul.msk.bf16.gmra.mxu2 %vm435_vm1, %v1425_v38  ;;  %v3634_v27 = vadd.f32 %v1242_v33, %v965_v49  ;;  %v1245_v56 = vpop.f32.mrf.mxu0  ;;  %v3638_v32 = vpop.f32.mrf.mxu1  ;;  %v1788_v33 = vrot.slane %v1787_v8, 4  ;;  %v1802_v16 = vrot.slane %v1800_v14, 5  ;;  %v2041_v49 = vrot.slane %v2039_v11, 4 }
 0x11e   : > { %v1810_v15 = vrot.slane %v1808_v24, 5  ;;  %v1816_v8 = vrot.slane %v1814_v47, 5  ;;  %v2531_v1 = vrot.slane %v3361_v42, 9  ;;  %v1387_v47 = vrot.slane %v1385_v17, 4 }
 0x11f   : > { %2606 = vmatmul.msk.bf16.gmra.mxu3 %vm435_vm1, %v2664_v30  ;;  %v1793_v30 = vsel %vm3055_vm4, %v1788_v33, %v1792_v40  ;;  %v2043_v55 = vsel %vm3172_vm7, %v2041_v49, %v2042_v58 }
 0x120   : > { %v773_v63 = vpop.f32.mrf.mxu2  ;;  %2614 = vmatmul.msk.bf16.gmra.mxu0 %vm435_vm1, %v1897_v7  ;;  %2632 = vmatmul.msk.bf16.gmra.mxu1 %vm435_vm1, %v2080_v6  ;;  %v1811_v33 = vor.u32 %v1810_v15, %v1807_v18  ;;  %v1821_v59 = vor.u32 %v1820_v50, %v1816_v8  ;;  %v2071_v24 = vunpack.c.l.b16 %v2043_v55  ;;  %v1386_v42 = vsel %vm3172_vm7, %v2531_v1, %v1385_v17  ;;  %v2563_v15 = vld [vmem:[%s3013_s9 + $0x60] sm:$0xf] }
 0x121   : > { %v804_v38 = vadd.f32 %v773_v63, %v3505_v12  ;;  %v1426_v63 = vpack.c.b16 %v1415_v23, %v1414_v44  ;;  %v2564_v23 = vld [vmem:[%s3013_s9 + $0x64] sm:$0xf]  ;;  %v1416_v50 = vunpack.c.l.b16 %v1386_v42 }
 0x122   : > { %v940_v12 = vpop.f32.mrf.mxu3  ;;  %v2046_v18 = vrot.slane %v2564_v23, 5 }
 0x123   : > { %v966_v60 = vadd.f32 %v935_v4, %v804_v38  ;;  %v1803_v4 = vsel %vm3055_vm4, %v1798_v34, %v1802_v16  ;;  %v1886_v38 = vunpack.c.l.b16 %v1793_v30  ;;  %v1824_v34 = vshll.u32 %v2562_v51, 16 }
 0x124   : > { %v1887_v3 = vunpack.c.l.b16 %v1803_v4  ;;  %v1822_v51 = vrot.slane %v1821_v59, 4  ;;  %v2048_v1 = vrot.slane %v2046_v18, 4 }
 0x125   : > { %v3649_v7 = vadd.f32 %v1245_v56, %v966_v60  ;;  %v1247_v37 = vpop.f32.mrf.mxu0  ;;  %v3655_v6 = vpop.f32.mrf.mxu1  ;;  %v2040_v56 = vsel %vm3172_vm7, %v2624_v20, %v2039_v11  ;;  %v1388_v11 = vrot.slane %v3381_v53, 5  ;;  %v1826_v58 = vrot.slane %v1824_v34, 5 }
 0x126   : > { %v2070_v57 = vunpack.c.l.b16 %v2040_v56  ;;  %v1838_v34 = vshll.u32 %v2564_v23, 16 }
 0x127   : > { %v1389_v30 = vsel %vm3172_vm7, %v1387_v47, %v1388_v11  ;;  %v1827_v55 = vsel %vm3055_vm4, %v1822_v51, %v1826_v58 }
 0x128   : > { %v775_v14 = vpop.f32.mrf.mxu2  ;;  %v2081_v44 = vpack.c.b16 %v2071_v24, %v2070_v57  ;;  %v1417_v17 = vunpack.c.l.b16 %v1389_v30  ;;  %v1840_v58 = vrot.slane %v1838_v34, 5 }
 0x129   : > { %v805_v40 = vadd.f32 %v775_v14, %v3521_v9  ;;  %v1898_v9 = vpack.c.b16 %v1887_v3, %v1886_v38  ;;  %v1829_v38 = vshrl.u32 %v2563_v15, 16  ;;  %v2625_v3 = vrot.slane %v2563_v15, 9 }
 0x12a   : > { %v942_v60 = vpop.f32.mrf.mxu3  ;;  %v1427_v57 = vpack.c.b16 %v1417_v17, %v1416_v50  ;;  %v2532_v50 = vrot.slane %v3392_v45, 9 }
 0x12b   : > { %v967_v16 = vadd.f32 %v937_v35, %v805_v40  ;;  %v1812_v35 = vrot.slane %v1811_v33, 4  ;;  %v2565_v40 = vld [vmem:[%s3013_s9 + $0x68] sm:$0x1]  ;;  %v1832_v33 = vshll.u32 %v2563_v15, 16  ;;  %v2047_v42 = vsel %vm3172_vm7, %v2625_v3, %v2046_v18  ;;  %v2666_v18 = vld [vmem:[%s3013_s9 + $0x60] sm:$0xff] }
 0x12c   : > { %v2567_v3 = vld [vmem:[%s3013_s9 + $0x70] sm:$0xf] }
 0x12d   : > { %2539 = vmatmul.msk.bf16.gmra.mxu2 %vm435_vm1, %v1426_v63  ;;  %v3667_v20 = vadd.f32 %v1247_v37, %v967_v16  ;;  %v1250_v49 = vpop.f32.mrf.mxu0  ;;  %v3674_v4 = vpop.f32.mrf.mxu1  ;;  %v1817_v56 = vsel %vm3055_vm4, %v1812_v35, %v1816_v8  ;;  %v1842_v16 = vshrl.u32 %v2564_v23, 16  ;;  %v1889_v8 = vunpack.c.l.b16 %v1827_v55 }
 0x12e   : > { %v1888_v24 = vunpack.c.l.b16 %v1817_v56  ;;  %v1834_v51 = vrot.slane %v1832_v33, 5  ;;  %v2053_v33 = vrot.slane %v2567_v3, 5 }
 0x12f   : > { %2607 = vmatmul.msk.bf16.gmra.mxu3 %vm435_vm1, %v2665_v54  ;;  %v1831_v54 = vrot.slane %v1829_v38, 4 }
 0x130   : > { %v778_v53 = vpop.f32.mrf.mxu2  ;;  %2615 = vmatmul.msk.bf16.gmra.mxu0 %vm435_vm1, %v1898_v9  ;;  %2633 = vmatmul.msk.bf16.gmra.mxu1 %vm435_vm1, %v2081_v44  ;;  %v1392_v9 = vrot.slane %v3395_v2, 5  ;;  %v1844_v44 = vrot.slane %v1842_v16, 4  ;;  %v1899_v2 = vpack.c.b16 %v1889_v8, %v1888_v24  ;;  %v2566_v8 = vld [vmem:[%s3013_s9 + $0x6c] sm:$0xf] }
 0x131   : > { %v806_v37 = vadd.f32 %v778_v53, %v3420_v26  ;;  %v2049_v26 = vrot.slane %v2565_v40, 5  ;;  %v2072_v53 = vunpack.c.l.b16 %v2047_v42  ;;  %v1835_v17 = vor.u32 %v1834_v51, %v1831_v54 }
 0x132   : > { %v945_v63 = vpop.f32.mrf.mxu3  ;;  %v1845_v56 = vor.u32 %v1844_v44, %v1840_v58  ;;  %v2626_v42 = vrot.slane %v2566_v8, 9 }
 0x133   : > { %v968_v14 = vadd.f32 %v940_v12, %v806_v37  ;;  %v2050_v35 = vsel %vm3172_vm7, %v2048_v1, %v2049_v26  ;;  %v1395_v37 = vrot.slane %v3411_v13, 5  ;;  %v1393_v13 = vsel %vm3172_vm7, %v2532_v50, %v1392_v9 }
 0x134   : > { %v2073_v30 = vunpack.c.l.b16 %v2050_v35  ;;  %v1836_v34 = vrot.slane %v1835_v17, 4  ;;  %v1846_v16 = vrot.slane %v1845_v56, 4  ;;  %v1418_v24 = vunpack.c.l.b16 %v1393_v13 }
 0x135   : > { %v3686_v59 = vadd.f32 %v1250_v49, %v968_v14  ;;  %v1252_v12 = vpop.f32.mrf.mxu0  ;;  %v3688_v47 = vpop.f32.mrf.mxu1  ;;  %v1394_v14 = vrot.slane %v1392_v9, 4  ;;  %v2055_v35 = vrot.slane %v2053_v33, 4 }
 0x136   : > { %v1841_v51 = vsel %vm3055_vm4, %v1836_v34, %v1840_v58 }
 0x137   : > { %v1396_v45 = vsel %vm3172_vm7, %v1394_v14, %v1395_v37  ;;  %v1866_v37 = vshrl.u32 %v2567_v3, 16  ;;  %v1890_v56 = vunpack.c.l.b16 %v1841_v51 }
 0x138   : > { %v780_v11 = vpop.f32.mrf.mxu2  ;;  %v1419_v54 = vunpack.c.l.b16 %v1396_v45 }
 0x139   : > { %v807_v49 = vadd.f32 %v780_v11, %v3431_v62  ;;  %v1848_v62 = vshll.u32 %v2565_v40, 16  ;;  %v2568_v11 = vld [vmem:[%s3013_s9 + $0x74] sm:$0x1]  ;;  %v1868_v13 = vrot.slane %v1866_v37, 4 }
 0x13a   : > { %v947_v15 = vpop.f32.mrf.mxu3  ;;  %v1428_v50 = vpack.c.b16 %v1419_v54, %v1418_v24 }
 0x13b   : > { %v969_v23 = vadd.f32 %v942_v60, %v807_v49  ;;  %v2082_v60 = vpack.c.b16 %v2073_v30, %v2072_v53  ;;  %v2056_v49 = vrot.slane %v2568_v11, 5  ;;  %v1856_v53 = vshll.u32 %v2566_v8, 16 }
 0x13c   : > { %v1862_v30 = vshll.u32 %v2567_v3, 16 }
 0x13d   : > { %2540 = vmatmul.msk.bf16.gmra.mxu2 %vm435_vm1, %v1427_v57  ;;  %v3700_v55 = vadd.f32 %v1252_v12, %v969_v23  ;;  %v1255_v38 = vpop.f32.mrf.mxu0  ;;  %v3707_v26 = vpop.f32.mrf.mxu1  ;;  %v1850_v12 = vrot.slane %v1848_v62, 5  ;;  %v2057_v58 = vsel %vm3172_vm7, %v2055_v35, %v2056_v49  ;;  %v1858_v3 = vrot.slane %v1856_v53, 5 }
 0x13e   : > { %v2075_v34 = vunpack.c.l.b16 %v2057_v58  ;;  %v1872_v49 = vshll.u32 %v2568_v11, 16 }
 0x13f   : > { %2608 = vmatmul.msk.bf16.gmra.mxu3 %vm435_vm1, %v2666_v18  ;;  %v2054_v18 = vsel %vm3172_vm7, %v2626_v42, %v2053_v33  ;;  %v1402_v33 = vrot.slane %v3447_v41, 5 }
 0x140   : > { %v783_v1 = vpop.f32.mrf.mxu2  ;;  %2616 = vmatmul.msk.bf16.gmra.mxu0 %vm435_vm1, %v1899_v2  ;;  %2634 = vmatmul.msk.bf16.gmra.mxu1 %vm435_vm1, %v2082_v60  ;;  %v1874_v37 = vrot.slane %v1872_v49, 5 }
 0x141   : > { %v808_v40 = vadd.f32 %v783_v1, %v3451_v10  ;;  %v1851_v10 = vsel %vm3055_vm4, %v1846_v16, %v1850_v12  ;;  %v1864_v1 = vrot.slane %v1862_v30, 5 }
 0x142   : > { %v950_v9 = vpop.f32.mrf.mxu3  ;;  %v1891_v62 = vunpack.c.l.b16 %v1851_v10 }
 0x143   : > { %v970_v57 = vadd.f32 %v945_v63, %v808_v40  ;;  %v1853_v63 = vshrl.u32 %v2566_v8, 16  ;;  %v2074_v40 = vunpack.c.l.b16 %v2054_v18  ;;  %v1869_v35 = vor.u32 %v1868_v13, %v1864_v1 }
 0x144   : > { %v1900_v12 = vpack.c.b16 %v1891_v62, %v1890_v56 }
 0x145   : > { %v3719_v44 = vadd.f32 %v1255_v38, %v970_v57  ;;  %v1257_v23 = vpop.f32.mrf.mxu0  ;;  %v3721_v14 = vpop.f32.mrf.mxu1  ;;  %v1399_v38 = vrot.slane %v3429_v29, 5  ;;  %v1855_v60 = vrot.slane %v1853_v63, 4  ;;  %v2667_v57 = vld [vmem:[%s3013_s9 + $0x6c] sm:$0xff]  ;;  %v2083_v51 = vpack.c.b16 %v2075_v34, %v2074_v40 }
 0x146   : > { %v1870_v30 = vrot.slane %v1869_v35, 4 }
 0x147   : > { %v1401_v29 = vrot.slane %v1399_v38, 4  ;;  %v1859_v42 = vor.u32 %v1858_v3, %v1855_v60 }
 0x148   : > { %v785_v2 = vpop.f32.mrf.mxu2  ;;  %v1875_v56 = vsel %vm3055_vm4, %v1870_v30, %v1874_v37 }
 0x149   : > { %v809_v17 = vadd.f32 %v785_v2, %v3465_v21  ;;  %v2793_v21 = vld [vmem:[%s3013_s9 + $0x60] sm:$0xf]  ;;  %v1860_v53 = vrot.slane %v1859_v42, 4  ;;  %v1893_v3 = vunpack.c.l.b16 %v1875_v56  ;;  %v3892_v42 = vld [vmem:[#allocation8_spill] sm:$0xff]  ;;  %s2668_s9 = sshll.u32 %s2872_s15, 4 }
 0x14a   : > { %v952_v16 = vpop.f32.mrf.mxu3  ;;  %v2533_v24 = vrot.slane %v2793_v21, 9  ;;  %s2273_s10 = sadd.s32 %s2668_s9, %s2639_s8  ;;  %s2814_s9 = scalar_lea.hbm %s3879_s3, 256 }
 0x14b   : > { %v971_v45 = vadd.f32 %v947_v15, %v809_v17  ;;  %v1865_v17 = vsel %vm3055_vm4, %v1860_v53, %v1864_v1  ;;  %s2640_s11 = sshll.u32 %s2273_s10, 2 }
 0x14c   : > { %v1400_v63 = vsel %vm3172_vm7, %v2533_v24, %v1399_v38  ;;  %v1892_v60 = vunpack.c.l.b16 %v1865_v17  ;;  %v3768_v17 = vld [vmem:[%s3878_s2] ss:$0 sm:$0xff]  ;;  %s2275_s20 = scalar_lea.hbm %s3879_s3, %s2640_s11 }
 0x14d   : > { %2541 = vmatmul.msk.bf16.gmra.mxu2 %vm435_vm1, %v1428_v50  ;;  %v3733_v8 = vadd.f32 %v1257_v23, %v971_v45  ;;  %v1260_v54 = vpop.f32.mrf.mxu0  ;;  %v3735_v10 = vpop.f32.mrf.mxu1  ;;  %v1403_v23 = vsel %vm3172_vm7, %v1401_v29, %v1402_v33  ;;  %v1420_v50 = vunpack.c.l.b16 %v1400_v63  ;;  %s2278_s24 = sshll.u32 %s2275_s20, 4  ;;  %s2279_s24 = int_to_ptr.hbm [resolvable:$true] %s2278_s24 }
 0x14e   : > { %v1421_v18 = vunpack.c.l.b16 %v1403_v23  ;;  %v1901_v40 = vpack.c.b16 %v1893_v3, %v1892_v60  ;;  %s2808_s28 = sshra.s32 %s2279_s24, 4  ;;  %s2809_s28 = int_to_ptr.hbm [resolvable:$true] %s2808_s28 }
 0x14f   : > { %2609 = vmatmul.msk.bf16.gmra.mxu3 %vm435_vm1, %v2667_v57  ;;  %s2810_s29 = scalar_lea.hbm %s2809_s28, 64  ;;  %p2815_p2 = scmp.lt.s32.totalorder %s2809_s28, %s3879_s3 }
 0x150   : > { %v788_v15 = vpop.f32.mrf.mxu2  ;;  %2617 = vmatmul.msk.bf16.gmra.mxu0 %vm435_vm1, %v1900_v12  ;;  %2635 = vmatmul.msk.bf16.gmra.mxu1 %vm435_vm1, %v2083_v51  ;;  %p2811_p13 = scmp.ne.s32.totalorder %s2809_s28, %s2810_s29  ;;  %p2816_p4 = scmp.lt.s32.totalorder %s2814_s9, %s2810_s29 }
 0x151   : > { %v810_v41 = vadd.f32 %v788_v15, %v3489_v25 }
 0x152   : > { %v955_v2 = vpop.f32.mrf.mxu3  ;;  %p2812_p0 = pnand %p2811_p13, %p2963_p3  ;;  %p2817_p5 = por %p2816_p4, %p2815_p2 }
 0x153   : > { %v972_v11 = vadd.f32 %v950_v9, %v810_v41  ;;  %v1429_v9 = vpack.c.b16 %v1421_v18, %v1420_v50 }
 0x154   : > { %p2813_p1 = pneg %p2812_p0 }
 0x155   : > { %v3745_v58 = vadd.f32 %v1260_v54, %v972_v11  ;;  %v1262_v25 = vpop.f32.mrf.mxu0  ;;  %v3751_v62 = vpop.f32.mrf.mxu1 }
 0x156   : > { %p2818_p6 = pnand %p2817_p5, %p2813_p1 }
 0x158   : > { %v790_v5 = vpop.f32.mrf.mxu2 }
 0x159   : > { %v811_v38 = vadd.f32 %v790_v5, %v3501_v22 }
 0x15a   : > { %v957_v45 = vpop.f32.mrf.mxu3 }
 0x15b   : > { %v973_v13 = vadd.f32 %v952_v16, %v811_v38 }
 0x15d   : > { %2542 = vmatmul.msk.bf16.gmra.mxu2 %vm435_vm1, %v1429_v9  ;;  %v3755_v34 = vadd.f32 %v1262_v25, %v973_v13  ;;  %v1265_v33 = vpop.f32.mrf.mxu0  ;;  %v2120_v12 = vpop.f32.mrf.mxu1 }
 0x160   : > { %v793_v1 = vpop.f32.mrf.mxu2  ;;  %2618 = vmatmul.msk.bf16.gmra.mxu0 %vm435_vm1, %v1901_v40 }
 0x161   : > { %v812_v57 = vadd.f32 %v793_v1, %v3891_v39 }
 0x162   : > { %v1628_v24 = vpop.f32.mrf.mxu3 }
 0x163   : > { %v974_v21 = vadd.f32 %v955_v2, %v812_v57  ;;  %v3893_v57 = vld [vmem:[#allocation5_spill] sm:$0xff] }
 0x165   : > { %v3759_v22 = vadd.f32 %v1265_v33, %v974_v21  ;;  %v1267_v54 = vpop.f32.mrf.mxu0  ;;  %v2122_v16 = vpop.f32.mrf.mxu1 }
 0x168   : > { %v795_v29 = vpop.f32.mrf.mxu2 }
 0x169   : > { %v813_v35 = vadd.f32 %v795_v29, %v3892_v42 }
 0x16a   : > { %v1630_v51 = vpop.f32.mrf.mxu3 }
 0x16b   : > { %v975_v49 = vadd.f32 %v957_v45, %v813_v35 }
 0x16d   : > { %v3762_v15 = vadd.f32 %v1267_v54, %v975_v49  ;;  %v1938_v41 = vpop.f32.mrf.mxu0  ;;  %v2125_v23 = vpop.f32.mrf.mxu1 }
 0x170   : > { %v1466_v63 = vpop.f32.mrf.mxu2 }
 0x171   : > { %v1506_v53 = vadd.f32 %v1466_v63, %v3550_v0 }
 0x172   : > { %v1633_v37 = vpop.f32.mrf.mxu3 }
 0x173   : > { %v1668_v30 = vadd.f32 %v1628_v24, %v1506_v53  ;;  %v3894_v24 = vld [vmem:[#allocation7_spill] sm:$0xff] }
 0x175   : > { %v1978_v11 = vadd.f32 %v1938_v41, %v1668_v30  ;;  %v1940_v2 = vpop.f32.mrf.mxu0  ;;  %v2127_v18 = vpop.f32.mrf.mxu1 }
 0x177   : > { %v2160_v25 = vadd.f32 %v2120_v12, %v1978_v11 }
 0x178   : > { %v1468_v50 = vpop.f32.mrf.mxu2 }
 0x179   : > { %v1507_v56 = vadd.f32 %v1468_v50, %v3568_v46  ;;  %v2180_v0 = vadd.f32 %v3768_v17, %v2160_v25 }
 0x17a   : > { %v1635_v38 = vpop.f32.mrf.mxu3 }
 0x17b   : > { %v1669_v5 = vadd.f32 %v1630_v51, %v1507_v56  ;;  %v2196_v40 = vmax.f32 %v2180_v0, 0.0 }
 0x17d   : > { %v1979_v9 = vadd.f32 %v1940_v2, %v1669_v5  ;;  %v1943_v60 = vpop.f32.mrf.mxu0  ;;  %v2130_v45 = vpop.f32.mrf.mxu1  ;;  %v2212_v21 = vadd.f32 %v2196_v40, %v3893_v57 }
 0x17f   : > { %v2161_v3 = vadd.f32 %v2122_v16, %v1979_v9 }
 0x180   : > { %v1471_v13 = vpop.f32.mrf.mxu2 }
 0x181   : > { %v2181_v33 = vadd.f32 %v3768_v17, %v2161_v3  ;;  %v1508_v1 = vadd.f32 %v1471_v13, %v3585_v28 }
 0x182   : > { %v1638_v46 = vpop.f32.mrf.mxu3 }
 0x183   : > { %v2197_v12 = vmax.f32 %v2181_v33, 0.0  ;;  %v1670_v39 = vadd.f32 %v1633_v37, %v1508_v1 }
 0x185   : > { %v2213_v54 = vadd.f32 %v2197_v12, %v3894_v24  ;;  %v1980_v29 = vadd.f32 %v1943_v60, %v1670_v39  ;;  %v1945_v42 = vpop.f32.mrf.mxu0  ;;  %v2132_v51 = vpop.f32.mrf.mxu1 }
 0x187   : > { %v2672_v16 = vpack.c.bf16 %v2213_v54, %v2212_v21  ;;  %v2162_v49 = vadd.f32 %v2125_v23, %v1980_v29 }
 0x188   : > { %v1473_v35 = vpop.f32.mrf.mxu2 }
 0x189   : > { %2673 = vst [vmem:[%s3779_s7] sm:$0xff] %v2672_v16   ;;  %v1509_v28 = vadd.f32 %v1473_v35, %v3601_v36  ;;  %v2182_v53 = vadd.f32 %v3768_v17, %v2162_v49  ;;  %v3895_v36 = vld [vmem:[#allocation9_spill] sm:$0xff] }
 0x18a   : > { %v1640_v63 = vpop.f32.mrf.mxu3 }
 0x18b   : > { %v1671_v41 = vadd.f32 %v1635_v38, %v1509_v28  ;;  %v2198_v50 = vmax.f32 %v2182_v53, 0.0 }
 0x18d   : > { %v1981_v30 = vadd.f32 %v1945_v42, %v1671_v41  ;;  %v1948_v37 = vpop.f32.mrf.mxu0  ;;  %v2135_v9 = vpop.f32.mrf.mxu1  ;;  %v2214_v60 = vadd.f32 %v2198_v50, %v3895_v36 }
 0x18f   : > { %v2163_v11 = vadd.f32 %v2127_v18, %v1981_v30 }
 0x190   : > { %v1476_v2 = vpop.f32.mrf.mxu2 }
 0x191   : > { %v2183_v25 = vadd.f32 %v3768_v17, %v2163_v11  ;;  %v1510_v56 = vadd.f32 %v1476_v2, %v3620_v48 }
 0x192   : > { %v1643_v23 = vpop.f32.mrf.mxu3 }
 0x193   : > { %v2199_v5 = vmax.f32 %v2183_v25, 0.0  ;;  %v1672_v0 = vadd.f32 %v1638_v46, %v1510_v56 }
 0x195   : > { %v2215_v38 = vadd.f32 %v2199_v5, %v3556_v52  ;;  %v1982_v3 = vadd.f32 %v1948_v37, %v1672_v0  ;;  %v1950_v13 = vpop.f32.mrf.mxu0  ;;  %v2137_v21 = vpop.f32.mrf.mxu1 }
 0x197   : > { %v2677_v40 = vpack.c.bf16 %v2215_v38, %v2214_v60  ;;  %v2164_v18 = vadd.f32 %v2130_v45, %v1982_v3 }
 0x198   : > { %v1478_v33 = vpop.f32.mrf.mxu2 }
 0x199   : > { %2709 = vst [vmem:[%s3779_s7 + $0x8] sm:$0xff] %v2677_v40   ;;  %v1511_v1 = vadd.f32 %v1478_v33, %v3634_v27  ;;  %v2184_v48 = vadd.f32 %v3768_v17, %v2164_v18 }
 0x19a   : > { %v1645_v39 = vpop.f32.mrf.mxu3 }
 0x19b   : > { %v1673_v12 = vadd.f32 %v1640_v63, %v1511_v1  ;;  %v2200_v29 = vmax.f32 %v2184_v48, 0.0 }
 0x19d   : > { %v1983_v57 = vadd.f32 %v1950_v13, %v1673_v12  ;;  %v1953_v46 = vpop.f32.mrf.mxu0  ;;  %v2216_v27 = vadd.f32 %v2200_v29, %v3575_v61  ;;  %v2140_v30 = vpop.f32.mrf.mxu1 }
 0x19f   : > { %v2165_v24 = vadd.f32 %v2132_v51, %v1983_v57 }
 0x1a0   : > { %v1481_v54 = vpop.f32.mrf.mxu2 }
 0x1a1   : > { %v2185_v52 = vadd.f32 %v3768_v17, %v2165_v24  ;;  %v1512_v42 = vadd.f32 %v1481_v54, %v3649_v7 }
 0x1a2   : > { %v1648_v45 = vpop.f32.mrf.mxu3 }
 0x1a3   : > { %v2201_v16 = vmax.f32 %v2185_v52, 0.0  ;;  %v1674_v35 = vadd.f32 %v1643_v23, %v1512_v42 }
 0x1a5   : > { %v2217_v49 = vadd.f32 %v2201_v16, %v3590_v19  ;;  %v1984_v28 = vadd.f32 %v1953_v46, %v1674_v35  ;;  %v1955_v41 = vpop.f32.mrf.mxu0  ;;  %v2142_v23 = vpop.f32.mrf.mxu1 }
 0x1a7   : > { %v2682_v63 = vpack.c.bf16 %v2217_v49, %v2216_v27  ;;  %v2166_v51 = vadd.f32 %v2135_v9, %v1984_v28 }
 0x1a8   : > { %v1483_v53 = vpop.f32.mrf.mxu2 }
 0x1a9   : > { %2710 = vst [vmem:[%s3779_s7 + $0x10] sm:$0xff] %v2682_v63   ;;  %v1513_v37 = vadd.f32 %v1483_v53, %v3667_v20  ;;  %v2186_v2 = vadd.f32 %v3768_v17, %v2166_v51 }
 0x1aa   : > { %v1650_v25 = vpop.f32.mrf.mxu3 }
 0x1ab   : > { %v1675_v11 = vadd.f32 %v1645_v39, %v1513_v37  ;;  %v2202_v5 = vmax.f32 %v2186_v2, 0.0 }
 0x1ad   : > { %v1985_v7 = vadd.f32 %v1955_v41, %v1675_v11  ;;  %v1958_v50 = vpop.f32.mrf.mxu0  ;;  %v2218_v9 = vadd.f32 %v2202_v5, %v3608_v31  ;;  %v2145_v39 = vpop.f32.mrf.mxu1 }
 0x1af   : > { %v2167_v56 = vadd.f32 %v2137_v21, %v1985_v7 }
 0x1b0   : > { %v1486_v61 = vpop.f32.mrf.mxu2 }
 0x1b1   : > { %v2187_v19 = vadd.f32 %v3768_v17, %v2167_v56  ;;  %v1514_v0 = vadd.f32 %v1486_v61, %v3686_v59 }
 0x1b2   : > { %v1653_v33 = vpop.f32.mrf.mxu3 }
 0x1b3   : > { %v2203_v36 = vmax.f32 %v2187_v19, 0.0  ;;  %v1676_v60 = vadd.f32 %v1648_v45, %v1514_v0 }
 0x1b5   : > { %v2219_v20 = vadd.f32 %v2203_v36, %v3622_v43  ;;  %v1986_v38 = vadd.f32 %v1958_v50, %v1676_v60  ;;  %v1960_v3 = vpop.f32.mrf.mxu0  ;;  %v2147_v45 = vpop.f32.mrf.mxu1 }
 0x1b7   : > { %v2687_v13 = vpack.c.bf16 %v2219_v20, %v2218_v9  ;;  %v2168_v18 = vadd.f32 %v2140_v30, %v1986_v38 }
 0x1b8   : > { %v1488_v40 = vpop.f32.mrf.mxu2 }
 0x1b9   : > { %2711 = vst [vmem:[%s3779_s7 + $0x18] sm:$0xff] %v2687_v13   ;;  %v1515_v1 = vadd.f32 %v1488_v40, %v3700_v55  ;;  %v2188_v59 = vadd.f32 %v3768_v17, %v2168_v18 }
 0x1ba   : > { %v1655_v54 = vpop.f32.mrf.mxu3 }
 0x1bb   : > { %v1677_v12 = vadd.f32 %v1650_v25, %v1515_v1  ;;  %v2204_v21 = vmax.f32 %v2188_v59, 0.0 }
 0x1bd   : > { %v1987_v48 = vadd.f32 %v1960_v3, %v1677_v12  ;;  %v1963_v57 = vpop.f32.mrf.mxu0  ;;  %v2220_v42 = vadd.f32 %v2204_v21, %v3638_v32  ;;  %v2150_v32 = vpop.f32.mrf.mxu1 }
 0x1bf   : > { %v2169_v46 = vadd.f32 %v2142_v23, %v1987_v48 }
 0x1c0   : > { %v1491_v31 = vpop.f32.mrf.mxu2 }
 0x1c1   : > { %v2189_v43 = vadd.f32 %v3768_v17, %v2169_v46  ;;  %v1516_v24 = vadd.f32 %v1491_v31, %v3719_v44 }
 0x1c2   : > { %v1658_v53 = vpop.f32.mrf.mxu3 }
 0x1c3   : > { %v2205_v29 = vmax.f32 %v2189_v43, 0.0  ;;  %v1678_v52 = vadd.f32 %v1653_v33, %v1516_v24 }
 0x1c5   : > { %v2221_v55 = vadd.f32 %v2205_v29, %v3655_v6  ;;  %v1988_v16 = vadd.f32 %v1963_v57, %v1678_v52  ;;  %v1965_v35 = vpop.f32.mrf.mxu0  ;;  %v2152_v9 = vpop.f32.mrf.mxu1 }
 0x1c7   : > { %v2692_v27 = vpack.c.bf16 %v2221_v55, %v2220_v42  ;;  %v2170_v28 = vadd.f32 %v2145_v39, %v1988_v16 }
 0x1c8   : > { %v1493_v49 = vpop.f32.mrf.mxu2 }
 0x1c9   : > { %2712 = vst [vmem:[%s3779_s7 + $0x20] sm:$0xff] %v2692_v27   ;;  %v1517_v41 = vadd.f32 %v1493_v49, %v3733_v8  ;;  %v2190_v44 = vadd.f32 %v3768_v17, %v2170_v28 }
 0x1ca   : > { %v1660_v5 = vpop.f32.mrf.mxu3 }
 0x1cb   : > { %v1679_v63 = vadd.f32 %v1655_v54, %v1517_v41  ;;  %v2206_v6 = vmax.f32 %v2190_v44, 0.0 }
 0x1cd   : > { %v1989_v30 = vadd.f32 %v1965_v35, %v1679_v63  ;;  %v1968_v51 = vpop.f32.mrf.mxu0  ;;  %v2222_v56 = vadd.f32 %v2206_v6, %v3674_v4 }
 0x1cf   : > { %v2171_v37 = vadd.f32 %v2147_v45, %v1989_v30 }
 0x1d0   : > { %v1496_v11 = vpop.f32.mrf.mxu2 }
 0x1d1   : > { %v2191_v2 = vadd.f32 %v3768_v17, %v2171_v37  ;;  %v1518_v7 = vadd.f32 %v1496_v11, %v3745_v58 }
 0x1d2   : > { %v1663_v4 = vpop.f32.mrf.mxu3 }
 0x1d3   : > { %v2207_v50 = vmax.f32 %v2191_v2, 0.0  ;;  %v1680_v25 = vadd.f32 %v1658_v53, %v1518_v7 }
 0x1d5   : > { %v2223_v8 = vadd.f32 %v2207_v50, %v3688_v47  ;;  %v1990_v61 = vadd.f32 %v1968_v51, %v1680_v25  ;;  %v1970_v0 = vpop.f32.mrf.mxu0 }
 0x1d7   : > { %v2697_v19 = vpack.c.bf16 %v2223_v8, %v2222_v56  ;;  %v2172_v36 = vadd.f32 %v2150_v32, %v1990_v61 }
 0x1d8   : > { %v1498_v23 = vpop.f32.mrf.mxu2 }
 0x1d9   : > { %2713 = vst [vmem:[%s3779_s7 + $0x28] sm:$0xff] %v2697_v19   ;;  %v1519_v60 = vadd.f32 %v1498_v23, %v3755_v34  ;;  %v2192_v38 = vadd.f32 %v3768_v17, %v2172_v36  ;;  %v2155_v34 = vpop.f32.mrf.mxu1 }
 0x1da   : > { %v1665_v43 = vpop.f32.mrf.mxu3 }
 0x1db   : > { %v1681_v20 = vadd.f32 %v1660_v5, %v1519_v60  ;;  %v2208_v13 = vmax.f32 %v2192_v38, 0.0 }
 0x1dd   : > { %v1991_v58 = vadd.f32 %v1970_v0, %v1681_v20  ;;  %v1973_v18 = vpop.f32.mrf.mxu0  ;;  %v2224_v39 = vadd.f32 %v2208_v13, %v3707_v26 }
 0x1df   : > { %v2173_v3 = vadd.f32 %v2152_v9, %v1991_v58 }
 0x1e0   : > { %v1501_v47 = vpop.f32.mrf.mxu2 }
 0x1e1   : > { %v2193_v40 = vadd.f32 %v3768_v17, %v2173_v3  ;;  %v1520_v33 = vadd.f32 %v1501_v47, %v3759_v22 }
 0x1e3   : > { %v2209_v1 = vmax.f32 %v2193_v40, 0.0  ;;  %v1682_v12 = vadd.f32 %v1663_v4, %v1520_v33 }
 0x1e5   : > { %v2225_v59 = vadd.f32 %v2209_v1, %v3721_v14  ;;  %v1992_v48 = vadd.f32 %v1973_v18, %v1682_v12  ;;  %v1975_v24 = vpop.f32.mrf.mxu0  ;;  %v2157_v14 = vpop.f32.mrf.mxu1 }
 0x1e7   : > { %v2702_v57 = vpack.c.bf16 %v2225_v59, %v2224_v39  ;;  %v2174_v31 = vadd.f32 %v2155_v34, %v1992_v48 }
 0x1e8   : > { %v1503_v46 = vpop.f32.mrf.mxu2 }
 0x1e9   : > { %2714 = vst [vmem:[%s3779_s7 + $0x30] sm:$0xff] %v2702_v57   ;;  %v1521_v21 = vadd.f32 %v1503_v46, %v3762_v15  ;;  %v2194_v54 = vadd.f32 %v3768_v17, %v2174_v31 }
 0x1eb   : > { %v1683_v22 = vadd.f32 %v1665_v43, %v1521_v21  ;;  %v2210_v52 = vmax.f32 %v2194_v54, 0.0 }
 0x1ed   : > { %v1993_v26 = vadd.f32 %v1975_v24, %v1683_v22  ;;  %v2226_v55 = vadd.f32 %v2210_v52, %v3735_v10 }
 0x1ef   : > { %v2175_v29 = vadd.f32 %v2157_v14, %v1993_v26 }
 0x1f1   : > { %v2195_v15 = vadd.f32 %v3768_v17, %v2175_v29 }
 0x1f3   : > { %v2211_v42 = vmax.f32 %v2195_v15, 0.0 }
 0x1f5   : > { %v2227_v16 = vadd.f32 %v2211_v42, %v3751_v62 }
 0x1f7   : > { %v2707_v35 = vpack.c.bf16 %v2227_v16, %v2226_v55 }
 0x1f9   : > { %2715 = vst [vmem:[%s3779_s7 + $0x38] sm:$0xff] %v2707_v35  }
 0x1fa   : > { %2821 = shalt.err (!%p2818_p6)
}
 0x1fb   : > { %s2890_s5 = smov 64   ;;  %s2891_s7 = smov 4  }
 0x1fc   : > { %2719 = dma.vmem_to_hbm [thread:$0]  (%p2963_p3), %s2277_s21, 1024, %s2279_s24, %s2261_s27, %s2890_s5, %s2890_s5, %s2891_s7  }
 0x1fd PF: > { %p2725_p7 = scmp.ge.s32.totalorder %s2888_s19, 2  ;;  %s2293_s11 = sand.u32 1, %s2860_s12  }
 0x1fe   : > { %s2294_s15 = scalar_lea.sflag [#allocation3], %s2293_s11 }
 0x1ff   : > { %p2722_p9 = pnand %p2725_p7, %p2972_p8 }
 0x201   : > { %p2723_p10 = pneg %p2722_p9 }
 0x203   : > { %2855 = dma.done.wait (%p2723_p10), %s2294_s15, 1024  }
 0x204   : > { %2857 = vsyncadd (%p2723_p10), %s2294_s15, 4294966272  ;;  %s16_s19 = sadd.s32 1, %s2888_s19   ;;  %s3896_s12 = smov %s2864_s13 }
 0x205   : > { %p13_p11 = scmp.ge.s32.totalorder %s16_s19, 6   ;;  %s3897_s13 = smov %s2868_s14 }
 0x206   : > { %s3898_s14 = smov %s2981_s30  ;;  %s3899_s15 = smov %s2880_s17 }
 0x207   : > { %s3900_s16 = smov %s2884_s18  ;;  %s3901_s17 = smov %s3904_s22 }
 0x208   : > { %s3902_s18 = smov %s3908_s23  ;;  %15 = sbr.rel (!%p13_p11) target bundleno = 5 (0x5), region = 79 }
 0x20d   :  { %2300 = vsyncpa [#allocation3], 1 }
 0x20e   :  { %2302 = vsyncpa [#allocation3 + $0x1], 1 }

</bundles_post_ra>
